<compile_context>
chip_gen: v6e
topology: v6e:2x2x1
jax: 0.10.0
libtpu: 0.0.40
codegen_flags: <defaults>
</compile_context>

<pallas_src>
import math

import jax
import jax.numpy as jnp
import numpy as np
from jax import lax
from jax.experimental import pallas as pl
from jax.experimental.pallas import tpu as pltpu


def _round_up(x, m):
    return (x + m - 1) // m * m


def _gather_rows(ids, table_ref):
    """Exact vectorized row gather: one-hot (TS, R) x (R, E) on the MXU.

    Each one-hot row selects exactly one table row, so with f32 accumulation
    the result equals table[ids] (up to the MXU's multi-pass f32 matmul).
    """
    rows = table_ref.shape[0]
    iota = lax.broadcasted_iota(jnp.int32, (ids.shape[0], rows), 1)
    onehot = (iota == ids).astype(table_ref.dtype)          # exact 0 / 1
    return jnp.dot(onehot, table_ref[...],
                   preferred_element_type=jnp.float32,
                   precision=jax.lax.Precision.HIGHEST)


def _embed_kernel(tok_ids_ref,    # VMEM (TS, 1) int32
                  seg_ids_ref,    # VMEM (TS, 1) int32
                  pos_ids_ref,    # VMEM (TS, 1) int32
                  tok_table_ref,  # VMEM (Vp, E)  resident
                  seg_table_ref,  # VMEM (3, E)   resident
                  pos_table_ref,  # VMEM (Sp, E)  resident
                  out_ref):       # VMEM (TS, E)
    # Token + position embeddings: vectorized one-hot MXU gathers.
    tok_emb = _gather_rows(tok_ids_ref[...], tok_table_ref)
    pos_emb = _gather_rows(pos_ids_ref[...], pos_table_ref)

    # Segment embedding: vectorized 3-way select (table has only 3 rows).
    sid = seg_ids_ref[...]                                   # (TS, 1) int32
    seg_emb = jnp.where(
        sid == 0, seg_table_ref[0:1, :],
        jnp.where(sid == 1, seg_table_ref[1:2, :], seg_table_ref[2:3, :])
    ).astype(jnp.float32)

    # Single dense store; no scratch round trip.
    out_ref[...] = (tok_emb + seg_emb + pos_emb).astype(out_ref.dtype)


def embedding_layer(token_ids, segment_label, tok_table, seg_table, pos_embed,
                    *, tile_tokens=256):
    """token_ids, segment_label: int [B, S]; returns [B, S, E] in tok_table.dtype."""
    B, S = token_ids.shape
    V, E = tok_table.shape
    dtype = tok_table.dtype
    itemsize = jnp.dtype(dtype).itemsize

    # Flatten (B, S) -> one token axis so each grid step stores a dense slab.
    T = B * S
    TS = min(tile_tokens, _round_up(T, 8))
    T_pad = _round_up(T, TS)

    tok_ids = token_ids.astype(jnp.int32).reshape(T)
    seg_ids = segment_label.astype(jnp.int32).reshape(T)
    pos_ids = jnp.tile(jnp.arange(S, dtype=jnp.int32), B)
    if T_pad != T:
        pad = ((0, T_pad - T),)
        tok_ids = jnp.pad(tok_ids, pad)
        seg_ids = jnp.pad(seg_ids, pad)
        pos_ids = jnp.pad(pos_ids, pad)
    tok_ids = tok_ids.reshape(T_pad, 1)
    seg_ids = seg_ids.reshape(T_pad, 1)
    pos_ids = pos_ids.reshape(T_pad, 1)

    # Resident gather tables (row counts padded to a sublane multiple; padded
    # rows are zero and never selected).
    Vp = _round_up(V, 8)
    tok_tab = tok_table if Vp == V else jnp.pad(tok_table, ((0, Vp - V), (0, 0)))
    Sp = _round_up(S, 8)
    pos_tab = pos_embed[:S].astype(dtype)
    if Sp != S:
        pos_tab = jnp.pad(pos_tab, ((0, Sp - S), (0, 0)))
    seg_tab = seg_table.astype(dtype)

    # VMEM budget: at most 80% of physical VMEM (v7x: 64 MiB), at least what
    # this kernel needs assuming worst-case double buffering everywhere.
    resident = (Vp + 3 + Sp) * E * itemsize
    per_step = TS * E * itemsize + 3 * TS * 128 * 4   # out tile + lane-padded id tiles
    onehot_bytes = TS * (Vp + Sp) * 4
    need = 2 * resident + 2 * per_step + onehot_bytes + (2 << 20)
    try:
        cap = int(pltpu.get_tpu_info().vmem_capacity_bytes)
    except Exception:
        cap = 64 << 20
    vmem_limit = int(min(cap - cap // 5, max(16 << 20, need)))

    grid = (T_pad // TS,)
    out_shape = jax.ShapeDtypeStruct((T_pad, E), dtype)

    def run(single_buffer_tables):
        tab_kw = dict(pipeline_mode=pl.Buffered(1)) if single_buffer_tables else {}
        grid_spec = pltpu.PrefetchScalarGridSpec(
            num_scalar_prefetch=0,
            grid=grid,
            in_specs=[
                pl.BlockSpec((TS, 1), lambda t: (t, 0)),        # token ids
                pl.BlockSpec((TS, 1), lambda t: (t, 0)),        # segment ids
                pl.BlockSpec((TS, 1), lambda t: (t, 0)),        # position ids
                pl.BlockSpec((Vp, E), lambda t: (0, 0), **tab_kw),  # token table (resident)
                pl.BlockSpec((3, E), lambda t: (0, 0), **tab_kw),   # segment table (resident)
                pl.BlockSpec((Sp, E), lambda t: (0, 0), **tab_kw),  # position table (resident)
            ],
            out_specs=pl.BlockSpec((TS, E), lambda t: (t, 0)),
        )
        return pl.pallas_call(
            _embed_kernel,
            out_shape=out_shape,
            grid_spec=grid_spec,
            compiler_params=pltpu.CompilerParams(
                dimension_semantics=("parallel",),
                vmem_limit_bytes=vmem_limit),
        )(tok_ids, seg_ids, pos_ids, tok_tab, seg_tab, pos_tab)

    try:
        out = jax.block_until_ready(run(True))
    except Exception:
        # Conservative retry if pipeline_mode=pl.Buffered(1) is rejected.
        out = run(False)

    if T_pad != T:
        out = out[:T]
    return out.reshape(B, S, E)


def make_position_embed(token_num, model_dim):
    """Sinusoidal position embeddings, same math as PositionEmbeddings.__init__."""
    position = jnp.arange(token_num, dtype=jnp.float32)[:, None]
    div_term = jnp.exp(jnp.arange(0, model_dim, 2, dtype=jnp.float32)
                       * -(math.log(10000.0) / model_dim))
    pe = jnp.zeros((token_num, model_dim), dtype=jnp.float32)
    pe = pe.at[:, 0::2].set(jnp.sin(position * div_term))
    pe = pe.at[:, 1::2].set(jnp.cos(position * div_term))
    return pe


if __name__ == "__main__":
    # ModelConfig stand-ins (synthetic, deterministic)
    VOCAB_SIZE = 100
    EMBED_SIZE = 128     # model_dim / embedding_size
    TOKEN_NUM = 16       # max positions
    PAD_INDEX = 0
    B, S = 2, 8

    key = jax.random.PRNGKey(0)
    k_tok, k_seg, k_ids, k_lbl = jax.random.split(key, 4)

    # nn.Embedding-style parameters (padding_idx row zeroed, as at init)
    tok_table = 0.02 * jax.random.normal(k_tok, (VOCAB_SIZE, EMBED_SIZE), jnp.float32)
    tok_table = tok_table.at[PAD_INDEX].set(0.0)
    seg_table = 0.02 * jax.random.normal(k_seg, (3, EMBED_SIZE), jnp.float32)
    seg_table = seg_table.at[PAD_INDEX].set(0.0)

    pos_embed = make_position_embed(TOKEN_NUM, EMBED_SIZE)

    token_ids = jax.random.randint(k_ids, (B, S), 0, VOCAB_SIZE, dtype=jnp.int32)
    segment_label = jax.random.randint(k_lbl, (B, S), 0, 3, dtype=jnp.int32)

    out = embedding_layer(token_ids, segment_label, tok_table, seg_table, pos_embed)
    out = jax.block_until_ready(out)

    # reference (plain JAX) check; gather is exact up to the MXU's multi-pass
    # f32 matmul decomposition, hence the slightly relaxed tolerance.
    ref = (tok_table[token_ids]
           + seg_table[segment_label]
           + pos_embed[:S][None, :, :])
    np.testing.assert_allclose(np.asarray(out), np.asarray(ref), rtol=1e-5, atol=3e-5)

    print("KERNEL_OK")
</pallas_src>

<mosaic_0001>
module attributes {stable_mosaic.version = 11 : i64} {
  func.func @_embed_kernel(%arg0: i32, %arg1: memref<16x1xi32, #tpu.memory_space<vmem>>, %arg2: memref<16x1xi32, #tpu.memory_space<vmem>>, %arg3: memref<16x1xi32, #tpu.memory_space<vmem>>, %arg4: memref<104x128xf32, #tpu.memory_space<vmem>>, %arg5: memref<3x128xf32, #tpu.memory_space<vmem>>, %arg6: memref<8x128xf32, #tpu.memory_space<vmem>>, %arg7: memref<16x128xf32, #tpu.memory_space<vmem>>) attributes {dimension_semantics = [#tpu.dimension_semantics<parallel>], iteration_bounds = array<i64: 1>, scalar_prefetch = 0 : i64, scratch_operands = 0 : i64, tpu.core_type = #tpu.core_type<tc>, window_params = [{transform_indices = @transform_0, window_bounds = array<i64: 16, 1>}, {transform_indices = @transform_1, window_bounds = array<i64: 16, 1>}, {transform_indices = @transform_2, window_bounds = array<i64: 16, 1>}, {pipeline_mode = #tpu.pipeline_mode<synchronous>, transform_indices = @transform_3, window_bounds = array<i64: 104, 128>}, {pipeline_mode = #tpu.pipeline_mode<synchronous>, transform_indices = @transform_4, window_bounds = array<i64: 3, 128>}, {pipeline_mode = #tpu.pipeline_mode<synchronous>, transform_indices = @transform_5, window_bounds = array<i64: 8, 128>}, {transform_indices = @transform_6, window_bounds = array<i64: 16, 128>}]} {
    %c0 = arith.constant 0 : index
    %c0_0 = arith.constant 0 : index
    %0 = vector.load %arg1[%c0, %c0_0] : memref<16x1xi32, #tpu.memory_space<vmem>>, vector<16x1xi32>
    %1 = tpu.iota {dimensions = array<i32: 1>} : vector<16x104xi32>
    %2 = vector.broadcast %0 : vector<16x1xi32> to vector<16x104xi32>
    %3 = arith.cmpi eq, %1, %2 : vector<16x104xi32>
    %4 = arith.extui %3 : vector<16x104xi1> to vector<16x104xi32>
    %5 = arith.sitofp %4 : vector<16x104xi32> to vector<16x104xf32>
    %c0_1 = arith.constant 0 : index
    %c0_2 = arith.constant 0 : index
    %6 = vector.load %arg4[%c0_1, %c0_2] : memref<104x128xf32, #tpu.memory_space<vmem>>, vector<104x128xf32>
    %cst = arith.constant dense<0.000000e+00> : vector<16x128xf32>
    %7 = tpu.matmul %5, %6, %cst {dimension_numbers = #tpu.dot_dimension_numbers<[1], [0], [0], [1], [0, 0, 1, 1], [], []>, precision = #tpu.contract_precision<fp32>} : vector<16x104xf32>, vector<104x128xf32>, vector<16x128xf32> -> vector<16x128xf32>
    %c0_3 = arith.constant 0 : index
    %c0_4 = arith.constant 0 : index
    %8 = vector.load %arg3[%c0_3, %c0_4] : memref<16x1xi32, #tpu.memory_space<vmem>>, vector<16x1xi32>
    %9 = tpu.iota {dimensions = array<i32: 1>} : vector<16x8xi32>
    %10 = vector.broadcast %8 : vector<16x1xi32> to vector<16x8xi32>
    %11 = arith.cmpi eq, %9, %10 : vector<16x8xi32>
    %12 = arith.extui %11 : vector<16x8xi1> to vector<16x8xi32>
    %13 = arith.sitofp %12 : vector<16x8xi32> to vector<16x8xf32>
    %c0_5 = arith.constant 0 : index
    %c0_6 = arith.constant 0 : index
    %14 = vector.load %arg6[%c0_5, %c0_6] : memref<8x128xf32, #tpu.memory_space<vmem>>, vector<8x128xf32>
    %cst_7 = arith.constant dense<0.000000e+00> : vector<16x128xf32>
    %15 = tpu.matmul %13, %14, %cst_7 {dimension_numbers = #tpu.dot_dimension_numbers<[1], [0], [0], [1], [0, 0, 1, 1], [], []>, precision = #tpu.contract_precision<fp32>} : vector<16x8xf32>, vector<8x128xf32>, vector<16x128xf32> -> vector<16x128xf32>
    %c0_8 = arith.constant 0 : index
    %c0_9 = arith.constant 0 : index
    %16 = vector.load %arg2[%c0_8, %c0_9] : memref<16x1xi32, #tpu.memory_space<vmem>>, vector<16x1xi32>
    %c0_i32 = arith.constant 0 : i32
    %17 = vector.broadcast %c0_i32 : i32 to vector<16x1xi32>
    %18 = arith.cmpi eq, %16, %17 : vector<16x1xi32>
    %c0_10 = arith.constant 0 : index
    %c0_11 = arith.constant 0 : index
    %19 = vector.load %arg5[%c0_10, %c0_11] : memref<3x128xf32, #tpu.memory_space<vmem>>, vector<1x128xf32>
    %c1_i32 = arith.constant 1 : i32
    %20 = vector.broadcast %c1_i32 : i32 to vector<16x1xi32>
    %21 = arith.cmpi eq, %16, %20 : vector<16x1xi32>
    %c1 = arith.constant 1 : index
    %c0_12 = arith.constant 0 : index
    %22 = vector.load %arg5[%c1, %c0_12] : memref<3x128xf32, #tpu.memory_space<vmem>>, vector<1x128xf32>
    %c2 = arith.constant 2 : index
    %c0_13 = arith.constant 0 : index
    %23 = vector.load %arg5[%c2, %c0_13] : memref<3x128xf32, #tpu.memory_space<vmem>>, vector<1x128xf32>
    %24 = vector.shape_cast %21 : vector<16x1xi1> to vector<16x1xi1>
    %25 = vector.broadcast %24 : vector<16x1xi1> to vector<16x128xi1>
    %26 = vector.shape_cast %22 : vector<1x128xf32> to vector<1x128xf32>
    %27 = vector.broadcast %26 : vector<1x128xf32> to vector<16x128xf32>
    %28 = vector.shape_cast %23 : vector<1x128xf32> to vector<1x128xf32>
    %29 = vector.broadcast %28 : vector<1x128xf32> to vector<16x128xf32>
    %30 = arith.select %25, %27, %29 : vector<16x128xi1>, vector<16x128xf32>
    %31 = vector.shape_cast %18 : vector<16x1xi1> to vector<16x1xi1>
    %32 = vector.broadcast %31 : vector<16x1xi1> to vector<16x128xi1>
    %33 = vector.shape_cast %19 : vector<1x128xf32> to vector<1x128xf32>
    %34 = vector.broadcast %33 : vector<1x128xf32> to vector<16x128xf32>
    %35 = arith.select %32, %34, %30 : vector<16x128xi1>, vector<16x128xf32>
    %36 = arith.addf %7, %35 : vector<16x128xf32>
    %37 = arith.addf %36, %15 : vector<16x128xf32>
    %c0_14 = arith.constant 0 : index
    %c0_15 = arith.constant 0 : index
    %38 = vector.load %arg7[%c0_14, %c0_15] : memref<16x128xf32, #tpu.memory_space<vmem>>, vector<16x128xf32>
    tpu.vector_store %arg7[%c0_14, %c0_15], %37 {strides = array<i32>} : memref<16x128xf32, #tpu.memory_space<vmem>>, vector<16x128xf32>,
    return
  }
  func.func @transform_0(%arg0: i32) -> (i32, i32) {
    %c0_i32 = arith.constant 0 : i32
    %c0_i32_0 = arith.constant 0 : i32
    return %arg0, %c0_i32 : i32, i32
  }
  func.func @transform_1(%arg0: i32) -> (i32, i32) {
    %c0_i32 = arith.constant 0 : i32
    %c0_i32_0 = arith.constant 0 : i32
    return %arg0, %c0_i32 : i32, i32
  }
  func.func @transform_2(%arg0: i32) -> (i32, i32) {
    %c0_i32 = arith.constant 0 : i32
    %c0_i32_0 = arith.constant 0 : i32
    return %arg0, %c0_i32 : i32, i32
  }
  func.func @transform_3(%arg0: i32) -> (i32, i32) {
    %c0_i32 = arith.constant 0 : i32
    %c0_i32_0 = arith.constant 0 : i32
    %c0_i32_1 = arith.constant 0 : i32
    return %c0_i32, %c0_i32_0 : i32, i32
  }
  func.func @transform_4(%arg0: i32) -> (i32, i32) {
    %c0_i32 = arith.constant 0 : i32
    %c0_i32_0 = arith.constant 0 : i32
    %c0_i32_1 = arith.constant 0 : i32
    return %c0_i32, %c0_i32_0 : i32, i32
  }
  func.func @transform_5(%arg0: i32) -> (i32, i32) {
    %c0_i32 = arith.constant 0 : i32
    %c0_i32_0 = arith.constant 0 : i32
    %c0_i32_1 = arith.constant 0 : i32
    return %c0_i32, %c0_i32_0 : i32, i32
  }
  func.func @transform_6(%arg0: i32) -> (i32, i32) {
    %c0_i32 = arith.constant 0 : i32
    %c0_i32_0 = arith.constant 0 : i32
    return %arg0, %c0_i32 : i32, i32
  }
}

module attributes {stable_mosaic.version = 11 : i64} {
  func.func @_embed_kernel(%arg0: i32, %arg1: memref<16x1xi32, #tpu.memory_space<vmem>>, %arg2: memref<16x1xi32, #tpu.memory_space<vmem>>, %arg3: memref<16x1xi32, #tpu.memory_space<vmem>>, %arg4: memref<104x128xf32, #tpu.memory_space<vmem>>, %arg5: memref<3x128xf32, #tpu.memory_space<vmem>>, %arg6: memref<8x128xf32, #tpu.memory_space<vmem>>, %arg7: memref<16x128xf32, #tpu.memory_space<vmem>>) attributes {dimension_semantics = [#tpu.dimension_semantics<parallel>], iteration_bounds = array<i64: 1>, scalar_prefetch = 0 : i64, scratch_operands = 0 : i64, tpu.core_type = #tpu.core_type<tc>, window_params = [{transform_indices = @transform_0, window_bounds = array<i64: 16, 1>}, {transform_indices = @transform_1, window_bounds = array<i64: 16, 1>}, {transform_indices = @transform_2, window_bounds = array<i64: 16, 1>}, {pipeline_mode = #tpu.pipeline_mode<synchronous>, transform_indices = @transform_3, window_bounds = array<i64: 104, 128>}, {pipeline_mode = #tpu.pipeline_mode<synchronous>, transform_indices = @transform_4, window_bounds = array<i64: 3, 128>}, {pipeline_mode = #tpu.pipeline_mode<synchronous>, transform_indices = @transform_5, window_bounds = array<i64: 8, 128>}, {transform_indices = @transform_6, window_bounds = array<i64: 16, 128>}]} {
    %c0 = arith.constant 0 : index
    %c0_0 = arith.constant 0 : index
    %0 = vector.load %arg1[%c0, %c0_0] : memref<16x1xi32, #tpu.memory_space<vmem>>, vector<16x1xi32>
    %1 = tpu.iota {dimensions = array<i32: 1>} : vector<16x104xi32>
    %2 = vector.broadcast %0 : vector<16x1xi32> to vector<16x104xi32>
    %3 = arith.cmpi eq, %1, %2 : vector<16x104xi32>
    %4 = arith.extui %3 : vector<16x104xi1> to vector<16x104xi32>
    %5 = arith.sitofp %4 : vector<16x104xi32> to vector<16x104xf32>
    %c0_1 = arith.constant 0 : index
    %c0_2 = arith.constant 0 : index
    %6 = vector.load %arg4[%c0_1, %c0_2] : memref<104x128xf32, #tpu.memory_space<vmem>>, vector<104x128xf32>
    %cst = arith.constant dense<0.000000e+00> : vector<16x128xf32>
    %7 = tpu.matmul %5, %6, %cst {dimension_numbers = #tpu.dot_dimension_numbers<[1], [0], [0], [1], [0, 0, 1, 1], [], []>, precision = #tpu.contract_precision<fp32>} : vector<16x104xf32>, vector<104x128xf32>, vector<16x128xf32> -> vector<16x128xf32>
    %c0_3 = arith.constant 0 : index
    %c0_4 = arith.constant 0 : index
    %8 = vector.load %arg3[%c0_3, %c0_4] : memref<16x1xi32, #tpu.memory_space<vmem>>, vector<16x1xi32>
    %9 = tpu.iota {dimensions = array<i32: 1>} : vector<16x8xi32>
    %10 = vector.broadcast %8 : vector<16x1xi32> to vector<16x8xi32>
    %11 = arith.cmpi eq, %9, %10 : vector<16x8xi32>
    %12 = arith.extui %11 : vector<16x8xi1> to vector<16x8xi32>
    %13 = arith.sitofp %12 : vector<16x8xi32> to vector<16x8xf32>
    %c0_5 = arith.constant 0 : index
    %c0_6 = arith.constant 0 : index
    %14 = vector.load %arg6[%c0_5, %c0_6] : memref<8x128xf32, #tpu.memory_space<vmem>>, vector<8x128xf32>
    %cst_7 = arith.constant dense<0.000000e+00> : vector<16x128xf32>
    %15 = tpu.matmul %13, %14, %cst_7 {dimension_numbers = #tpu.dot_dimension_numbers<[1], [0], [0], [1], [0, 0, 1, 1], [], []>, precision = #tpu.contract_precision<fp32>} : vector<16x8xf32>, vector<8x128xf32>, vector<16x128xf32> -> vector<16x128xf32>
    %c0_8 = arith.constant 0 : index
    %c0_9 = arith.constant 0 : index
    %16 = vector.load %arg2[%c0_8, %c0_9] : memref<16x1xi32, #tpu.memory_space<vmem>>, vector<16x1xi32>
    %c0_i32 = arith.constant 0 : i32
    %17 = vector.broadcast %c0_i32 : i32 to vector<16x1xi32>
    %18 = arith.cmpi eq, %16, %17 : vector<16x1xi32>
    %c0_10 = arith.constant 0 : index
    %c0_11 = arith.constant 0 : index
    %19 = vector.load %arg5[%c0_10, %c0_11] : memref<3x128xf32, #tpu.memory_space<vmem>>, vector<1x128xf32>
    %c1_i32 = arith.constant 1 : i32
    %20 = vector.broadcast %c1_i32 : i32 to vector<16x1xi32>
    %21 = arith.cmpi eq, %16, %20 : vector<16x1xi32>
    %c1 = arith.constant 1 : index
    %c0_12 = arith.constant 0 : index
    %22 = vector.load %arg5[%c1, %c0_12] : memref<3x128xf32, #tpu.memory_space<vmem>>, vector<1x128xf32>
    %c2 = arith.constant 2 : index
    %c0_13 = arith.constant 0 : index
    %23 = vector.load %arg5[%c2, %c0_13] : memref<3x128xf32, #tpu.memory_space<vmem>>, vector<1x128xf32>
    %24 = vector.shape_cast %21 : vector<16x1xi1> to vector<16x1xi1>
    %25 = vector.broadcast %24 : vector<16x1xi1> to vector<16x128xi1>
    %26 = vector.shape_cast %22 : vector<1x128xf32> to vector<1x128xf32>
    %27 = vector.broadcast %26 : vector<1x128xf32> to vector<16x128xf32>
    %28 = vector.shape_cast %23 : vector<1x128xf32> to vector<1x128xf32>
    %29 = vector.broadcast %28 : vector<1x128xf32> to vector<16x128xf32>
    %30 = arith.select %25, %27, %29 : vector<16x128xi1>, vector<16x128xf32>
    %31 = vector.shape_cast %18 : vector<16x1xi1> to vector<16x1xi1>
    %32 = vector.broadcast %31 : vector<16x1xi1> to vector<16x128xi1>
    %33 = vector.shape_cast %19 : vector<1x128xf32> to vector<1x128xf32>
    %34 = vector.broadcast %33 : vector<1x128xf32> to vector<16x128xf32>
    %35 = arith.select %32, %34, %30 : vector<16x128xi1>, vector<16x128xf32>
    %36 = arith.addf %7, %35 : vector<16x128xf32>
    %37 = arith.addf %36, %15 : vector<16x128xf32>
    %c0_14 = arith.constant 0 : index
    %c0_15 = arith.constant 0 : index
    %38 = vector.load %arg7[%c0_14, %c0_15] : memref<16x128xf32, #tpu.memory_space<vmem>>, vector<16x128xf32>
    tpu.vector_store %arg7[%c0_14, %c0_15], %37 {strides = array<i32>} : memref<16x128xf32, #tpu.memory_space<vmem>>, vector<16x128xf32>,
    return
  }
  func.func @transform_0(%arg0: i32) -> (i32, i32) {
    %c0_i32 = arith.constant 0 : i32
    %c0_i32_0 = arith.constant 0 : i32
    return %arg0, %c0_i32 : i32, i32
  }
  func.func @transform_1(%arg0: i32) -> (i32, i32) {
    %c0_i32 = arith.constant 0 : i32
    %c0_i32_0 = arith.constant 0 : i32
    return %arg0, %c0_i32 : i32, i32
  }
  func.func @transform_2(%arg0: i32) -> (i32, i32) {
    %c0_i32 = arith.constant 0 : i32
    %c0_i32_0 = arith.constant 0 : i32
    return %arg0, %c0_i32 : i32, i32
  }
  func.func @transform_3(%arg0: i32) -> (i32, i32) {
    %c0_i32 = arith.constant 0 : i32
    %c0_i32_0 = arith.constant 0 : i32
    %c0_i32_1 = arith.constant 0 : i32
    return %c0_i32, %c0_i32_0 : i32, i32
  }
  func.func @transform_4(%arg0: i32) -> (i32, i32) {
    %c0_i32 = arith.constant 0 : i32
    %c0_i32_0 = arith.constant 0 : i32
    %c0_i32_1 = arith.constant 0 : i32
    return %c0_i32, %c0_i32_0 : i32, i32
  }
  func.func @transform_5(%arg0: i32) -> (i32, i32) {
    %c0_i32 = arith.constant 0 : i32
    %c0_i32_0 = arith.constant 0 : i32
    %c0_i32_1 = arith.constant 0 : i32
    return %c0_i32, %c0_i32_0 : i32, i32
  }
  func.func @transform_6(%arg0: i32) -> (i32, i32) {
    %c0_i32 = arith.constant 0 : i32
    %c0_i32_0 = arith.constant 0 : i32
    return %arg0, %c0_i32 : i32, i32
  }
}

</mosaic_0001>

<bundles_post_ra>
// kernel: tpu_custom_call.1
= control target key start
LH: loop header
LB: loop body
LE: loop exit
PB: predicated region body
PF: predicated region fallthrough
CT: control target
= control target key end

     0   :  { %11 = vsyncpa [#allocation3], 0  ;;  %s2097_s0 = inlined_call_operand.vmem [shape: s32[16,1], index: 0, kind: input, shape index: {}]   ;;  %s2098_s1 = inlined_call_operand.vmem [shape: s32[16,1], index: 1, kind: input, shape index: {}]   ;;  %s2099_s2 = inlined_call_operand.vmem [shape: s32[16,1], index: 2, kind: input, shape index: {}]   ;;  %s2100_s3 = inlined_call_operand.hbm [shape: f32[104,128], index: 3, kind: input, shape index: {}]   ;;  %s2101_s4 = inlined_call_operand.vmem [shape: f32[3,128], index: 4, kind: input, shape index: {}]   ;;  %s2102_s5 = inlined_call_operand.vmem [shape: f32[8,128], index: 5, kind: input, shape index: {}]   ;;  %s2103_s6 = inlined_call_operand.hbm [shape: f32[16,128], index: 6, kind: output, shape index: {}]  }
   0x1   :  { %12 = vsyncpa [#allocation4], 0  ;;  %s1679_s21 = smov [#allocation2]  }
   0x2   :  { %s24_s22 = sshll.u32 %s1679_s21, 4  ;;  %s25_s22 = int_to_ptr.vmem [resolvable:$true] %s24_s22 }
   0x3   :  { %s1643_s23 = scalar_lea.vmem %s25_s22, 1664  ;;  %p1648_p1 = scmp.lt.s32.totalorder %s25_s22, %s25_s22 }
   0x4   :  { %p1644_p0 = scmp.ne.s32.totalorder %s25_s22, %s1643_s23  ;;  %p1649_p2 = scmp.lt.s32.totalorder %s1643_s23, %s1643_s23 }
   0x6   :  { %p1650_p3 = por %p1649_p2, %p1648_p1 }
   0x8   :  { %p1651_p4 = pnand %p1650_p3, %p1644_p0 }
   0xa   :  { %1654 = shalt.err (!%p1651_p4)
}
   0xb   :  { %s1680_s24 = smov 128   ;;  %s1681_s25 = smov 8  }
   0xc   :  { %30 = dma.hbm_to_vmem [thread:$0]  %s2100_s3, 1664, %s25_s22, [#allocation3], %s1680_s24, %s1680_s24, %s1681_s25  }
   0xd   :  { %1675 = dma.done.wait [#allocation3], 1664  }
   0xe   :  { %1676 = vsyncadd [#allocation3], 4294965632  ;;  %v1682_v0 = vmov 0   ;;  %v67_v1 = vld [vmem:[%s2099_s2] sm:$0xff]  ;;  %v579_v4 = vld [vmem:[%s2098_s1 + $0x8] sm:$0xff]  ;;  %v40_v18 = vlaneseq  ;;  %vm82_vm4 = vcmask 64512  }
   0xf   :  { %1633 = vset.pattern.permute.xlu0 %v1682_v0  ;;  %1634 = vset.pattern.permute.xlu1 %v1682_v0  ;;  %v578_v2 = vld [vmem:[%s2098_s1] sm:$0xff]  ;;  %v68_v5 = vld [vmem:[%s2099_s2 + $0x8] sm:$0xff]  ;;  %vm584_vm1 = vcmp.eq.s32.totalorder %v579_v4, 1  ;;  %vm581_vm3 = vcmp.eq.s32.totalorder %v579_v4, 0  ;;  %v65_v20 = vld [vmem:[#allocation2 + $0x58] sm:$0xff]  ;;  %v1683_v31 = vmov 0.0  }
  0x10   :  { %70 = vperm.xlu0 %1633, %v67_v1   ;;  %v38_v3 = vld [vmem:[%s2097_s0] sm:$0xff]  ;;  %vm583_vm0 = vcmp.eq.s32.totalorder %v578_v2, 1  ;;  %v39_v7 = vld [vmem:[%s2097_s0 + $0x8] sm:$0xff]  ;;  %vm580_vm2 = vcmp.eq.s32.totalorder %v578_v2, 0  ;;  %v588_v11 = vsel %vm584_vm1, 1, %v1682_v0  ;;  %v608_v15 = vsel %vm581_vm3, 1, %v1682_v0 }
  0x11   :  { %43 = vperm.xlu1 %1634, %v38_v3   ;;  %v81_v6 = vld [vmem:[%s2102_s5] sm:$0xff]  ;;  %v587_v10 = vsel %vm583_vm0, 1, %v1682_v0  ;;  %v607_v14 = vsel %vm580_vm2, 1, %v1682_v0  ;;  %v64_v21 = vld [vmem:[#allocation2 + $0x50] sm:$0xff]  ;;  %v1763_v22 = vand.u32 127, %v40_v18  ;;  %v1768_v24 = vand.u32 4294901760, %v65_v20 }
  0x12   :  { %v1747_v8 = vand.u32 4294901760, %v81_v6  ;;  %v66_v17 = vld [vmem:[#allocation2 + $0x60] sm:$0xff]  ;;  %v1770_v25 = vand.u32 4294901760, %v64_v21  ;;  %v63_v26 = vld [vmem:[#allocation2 + $0x48] sm:$0xff]  ;;  %v61_v34 = vld [vmem:[#allocation2 + $0x38] sm:$0xff]  ;;  %vm623_vm8 = vcmask 850944  }
  0x13   :  { %v1761_v19 = vand.u32 4294901760, %v66_v17  ;;  %v1777_v29 = vsub.f32 %v65_v20, %v1768_v24  ;;  %v62_v30 = vld [vmem:[#allocation2 + $0x40] sm:$0xff]  ;;  %v1782_v33 = vand.u32 4294901760, %v63_v26  ;;  %v1799_v42 = vand.u32 4294901760, %v61_v34  ;;  %v60_v43 = vld [vmem:[#allocation2 + $0x30] sm:$0xff]  ;;  %v59_v49 = vld [vmem:[#allocation2 + $0x28] sm:$0xff] }
  0x14   :  { %73 = vperm.xlu0 %1633, %v68_v5   ;;  %v1750_v9 = vsub.f32 %v81_v6, %v1747_v8  ;;  %1423 = vmatprep.subr.mxu0 %v1747_v8  ;;  %v1789_v36 = vsub.f32 %v64_v21, %v1770_v25  ;;  %v1791_v39 = vand.u32 4294901760, %v62_v30  ;;  %v1818_v53 = vand.u32 4294901760, %v60_v43  ;;  %v58_v57 = vld [vmem:[#allocation2 + $0x20] sm:$0xff]  ;;  %v57_v63 = vld [vmem:[#allocation2 + $0x18] sm:$0xff]  ;;  %v56_v6 = vld [vmem:[#allocation2 + $0x10] sm:$0xff] }
  0x15   :  { %46 = vperm.xlu1 %1634, %v39_v7   ;;  %1424 = vmatpush3.msra.mxu0 %v1747_v8  ;;  %v1766_v23 = vsub.f32 %v66_v17, %v1761_v19  ;;  %v1797_v41 = vand.u32 4294901760, %v1777_v29  ;;  %v1805_v46 = vsub.f32 %v63_v26, %v1782_v33  ;;  %v1824_v56 = vsub.f32 %v61_v34, %v1799_v42  ;;  %v54_v34 = vld [vmem:[#allocation2] sm:$0xff] }
  0x16   :  { %v1755_v12 = vand.u32 4294901760, %v1750_v9  ;;  %1433 = vmatprep.subr.mxu0 %v1750_v9  ;;  %v1812_v48 = vand.u32 4294901760, %v1789_v36  ;;  %v1816_v52 = vsub.f32 %v62_v30, %v1791_v39  ;;  %v1829_v61 = vand.u32 4294901760, %v59_v49 }
  0x17   :  { %v1774_v28 = vand.u32 4294901760, %v1766_v23  ;;  %v745_v55 = vsub.f32 %v1777_v29, %v1797_v41  ;;  %v1827_v60 = vand.u32 4294901760, %v1805_v46  ;;  %v1837_v2 = vsub.f32 %v60_v43, %v1818_v53 }
  0x18   :  { %590 = vperm.xlu0 %1633, %v587_v10   ;;  %v209_v13 = vsub.f32 %v1750_v9, %v1755_v12  ;;  %v752_v62 = vsub.f32 %v1789_v36, %v1812_v48  ;;  %v1834_v1 = vand.u32 4294901760, %v1816_v52  ;;  %v1839_v3 = vand.u32 4294901760, %v58_v57 }
  0x19   :  { %593 = vperm.xlu1 %1634, %v588_v11   ;;  %v738_v40 = vsub.f32 %v1766_v23, %v1774_v28  ;;  %v746_v4 = vand.u32 4294901760, %v745_v55  ;;  %v1845_v5 = vand.u32 4294901760, %v1824_v56  ;;  %v759_v10 = vsub.f32 %v1805_v46, %v1827_v60 }
  0x1a   :  { %v210_v16 = vand.u32 4294901760, %v209_v13  ;;  %v1850_v11 = vsub.f32 %v59_v49, %v1829_v61  ;;  %v1852_v13 = vand.u32 4294901760, %v57_v63  ;;  %v1862_v17 = vsub.f32 %v58_v57, %v1839_v3 }
  0x1b   :  { %v739_v54 = vand.u32 4294901760, %v738_v40  ;;  %v1864_v18 = vand.u32 4294901760, %v56_v6  ;;  %v773_v20 = vsub.f32 %v1824_v56, %v1845_v5  ;;  %v760_v21 = vand.u32 4294901760, %v759_v10 }
  0x1c   :  { %610 = vperm.xlu0 %1633, %v607_v14   ;;  %1428 = vmatprep.subr.mxu1 %v210_v16  ;;  %v753_v14 = vand.u32 4294901760, %v752_v62  ;;  %v1870_v26 = vand.u32 4294901760, %v1850_v11 }
  0x1d   :  { %613 = vperm.xlu1 %1634, %v608_v15   ;;  %1429 = vmatpush3.msra.mxu1 %v210_v16  ;;  %v55_v15 = vld [vmem:[#allocation2 + $0x8] sm:$0xff]  ;;  %v1859_v16 = vand.u32 4294901760, %v1837_v2  ;;  %v774_v43 = vand.u32 4294901760, %v773_v20 }
  0x1e   :  { %1438 = vmatprep.subr.mxu1 %v1747_v8  ;;  %v1875_v30 = vand.u32 4294901760, %v55_v15 }
  0x8b   :  { %v71_v27 = vpop.permute.xlu0 %70 }
  0x8c   :  { %vm75_vm5 = vcmp.eq.s32.totalorder %v1763_v22, %v71_v27  ;;  %v1873_v27 = vsub.f32 %v57_v63, %v1852_v13  ;;  %v44_v40 = vpop.permute.xlu1 %43 }
  0x8d   :  { %v1780_v32 = vsel %vm75_vm5, 1.0, %v1683_v31  ;;  %vm48_vm7 = vcmp.eq.s32.totalorder %v1763_v22, %v44_v40 }
  0x8e   :  { %v84_v35 = vsel %vm82_vm4, %v1780_v32, 0  ;;  %1430 = vmatprep.mubr.msk.f32.mxu1 %vm82_vm4, %v1780_v32  ;;  %v1895_v49 = vand.u32 4294901760, %v1873_v27 }
  0x8f   :  { %v156_v37 = vsub.f32 %v84_v35, %v84_v35  ;;  %v74_v38 = vpop.permute.xlu0 %73  ;;  %v780_v35 = vsub.f32 %v1837_v2, %v1859_v16 }
  0x90   :  { %vm76_vm6 = vcmp.eq.s32.totalorder %v1763_v22, %v74_v38  ;;  %v1884_v38 = vsub.f32 %v56_v6, %v1864_v18  ;;  %v801_v57 = vsub.f32 %v1873_v27, %v1895_v49  ;;  %v47_v62 = vpop.permute.xlu1 %46 }
  0x91   :  { %v1802_v44 = vsel %vm76_vm6, 1.0, %v1683_v31  ;;  %v157_v45 = vand.u32 4294901760, %v156_v37  ;;  %vm49_vm9 = vcmp.eq.s32.totalorder %v1763_v22, %v47_v62 }
  0x92   :  { %v87_v47 = vsel %vm82_vm4, %v1802_v44, 0  ;;  %1431 = vmatmul.mubr.msk.f32.vlgmr.msra.gmra.mxu1 %vm82_vm4, %v1802_v44  ;;  %v802_v6 = vand.u32 4294901760, %v801_v57 }
  0x93   :  { %v166_v50 = vsub.f32 %v87_v47, %v87_v47  ;;  %1440 = vmatprep.mubr.f32.mxu1 %v157_v45  ;;  %1439 = vmatpush3.msra.mxu1 %v1747_v8  ;;  %v158_v51 = vsub.f32 %v156_v37, %v157_v45  ;;  %v1887_v45 = vand.u32 4294901760, %v54_v34  ;;  %v787_v47 = vsub.f32 %v1850_v11, %v1870_v26 }
  0x94   :  { %1448 = vmatprep.subr.mxu1 %v1747_v8 }
  0x95   :  { %v159_v58 = vand.u32 4294901760, %v158_v51  ;;  %v167_v59 = vand.u32 4294901760, %v166_v50  ;;  %v1906_v51 = vand.u32 4294901760, %v1884_v38  ;;  %v1913_v55 = vsub.f32 %v54_v34, %v1887_v45 }
  0x97   :  { %1425 = vmatprep.mubr.f32.mxu0 %v159_v58  ;;  %1441 = vmatmul.mubr.f32.vlgmr.msra.gmra.mxu1 %v167_v59  ;;  %v168_v0 = vsub.f32 %v166_v50, %v167_v59 }
  0x98   :  { %1450 = vmatprep.mubr.msk.f32.mxu1 %vm82_vm4, %v1780_v32  ;;  %1449 = vmatpush3.msra.mxu1 %v1747_v8  ;;  %v766_v8 = vsub.f32 %v1816_v52, %v1834_v1 }
  0x99   :  { %1482 = vmatprep.subr.mxu1 %v739_v54  ;;  %v169_v7 = vand.u32 4294901760, %v168_v0  ;;  %v808_v0 = vsub.f32 %v1884_v38, %v1906_v51 }
  0x9b   :  { %1426 = vmatmul.mubr.f32.vlgmr.msra.gmra.mxu0 %v169_v7  ;;  %1451 = vmatmul.mubr.msk.f32.vlgmr.msra.gmra.mxu1 %vm82_vm4, %v1802_v44  ;;  %v809_v22 = vand.u32 4294901760, %v808_v0 }
  0x9c   :  { %1434 = vmatpush3.msra.mxu0 %v1750_v9  ;;  %1483 = vmatpush3.msra.mxu1 %v739_v54  ;;  %v767_v9 = vand.u32 4294901760, %v766_v8  ;;  %v1909_v54 = vsel %vm48_vm7, 1.0, %v1683_v31 }
  0x9d   :  { %1435 = vmatprep.mubr.f32.mxu0 %v156_v37  ;;  %1484 = vmatprep.subr.mxu1 %v746_v4  ;;  %v1881_v37 = vand.u32 4294901760, %v1862_v17  ;;  %v625_v59 = vsel %vm623_vm8, %v1909_v54, 0 }
  0x9e   :  { %1485 = vmatpush3.msra.mxu1 %v746_v4  ;;  %1443 = vmatprep.subr.mxu0 %v1755_v12  ;;  %v1930_v4 = vand.u32 4294901760, %v1913_v55  ;;  %v709_v10 = vsub.f32 %v625_v59, %v625_v59 }
  0x9f   :  { %1486 = vmatprep.subr.mxu1 %v753_v14  ;;  %1436 = vmatmul.mubr.f32.vlgmr.msra.gmra.mxu0 %v166_v50  ;;  %v1898_v50 = vsub.f32 %v55_v15, %v1875_v30 }
  0xa0   :  { %1444 = vmatpush3.msra.mxu0 %v1755_v12  ;;  %1487 = vmatpush3.msra.mxu1 %v753_v14  ;;  %v781_v12 = vand.u32 4294901760, %v780_v35  ;;  %v1937_v14 = vsel %vm49_vm9, 1.0, %v1683_v31  ;;  %v822_v15 = vsub.f32 %v1913_v55, %v1930_v4  ;;  %v710_v31 = vand.u32 4294901760, %v709_v10 }
  0xa1   :  { %1445 = vmatprep.mubr.msk.f32.mxu0 %vm82_vm4, %v1780_v32  ;;  %1488 = vmatprep.subr.mxu1 %v760_v21  ;;  %v794_v32 = vsub.f32 %v1862_v17, %v1881_v37  ;;  %v1919_v58 = vand.u32 4294901760, %v1898_v50  ;;  %v628_v20 = vsel %vm623_vm8, %v1937_v14, 0 }
  0xa2   :  { %1489 = vmatpush3.msra.mxu1 %v760_v21  ;;  %1453 = vmatprep.subr.mxu0 %v1761_v19  ;;  %v823_v21 = vand.u32 4294901760, %v822_v15  ;;  %v1949_v34 = vsub.f32 %v628_v20, %v628_v20 }
  0xa3   :  { %1490 = vmatprep.subr.mxu1 %v767_v9  ;;  %1446 = vmatmul.mubr.msk.f32.vlgmr.msra.gmra.mxu0 %vm82_vm4, %v1802_v44  ;;  %v788_v44 = vand.u32 4294901760, %v787_v47  ;;  %v795_v63 = vand.u32 4294901760, %v794_v32  ;;  %v815_v7 = vsub.f32 %v1898_v50, %v1919_v58 }
  0xa4   :  { %1454 = vmatpush3.msra.mxu0 %v1761_v19  ;;  %1491 = vmatpush3.msra.mxu1 %v767_v9  ;;  %v711_v9 = vsub.f32 %v709_v10, %v710_v31  ;;  %v720_v35 = vand.u32 4294901760, %v1949_v34 }
  0xa5   :  { %1455 = vmatprep.subr.mxu0 %v1768_v24  ;;  %1492 = vmatprep.subr.mxu1 %v774_v43  ;;  %v816_v8 = vand.u32 4294901760, %v815_v7 }
  0xa6   :  { %1456 = vmatpush3.msra.mxu0 %v1768_v24  ;;  %1493 = vmatpush3.msra.mxu1 %v774_v43  ;;  %v712_v40 = vand.u32 4294901760, %v711_v9  ;;  %v721_v43 = vsub.f32 %v1949_v34, %v720_v35 }
  0xa7   :  { %1457 = vmatprep.subr.mxu0 %v1770_v25  ;;  %1494 = vmatprep.subr.mxu1 %v781_v12 }
  0xa8   :  { %1458 = vmatpush3.msra.mxu0 %v1770_v25  ;;  %1495 = vmatpush3.msra.mxu1 %v781_v12  ;;  %v722_v47 = vand.u32 4294901760, %v721_v43 }
  0xa9   :  { %1459 = vmatprep.subr.mxu0 %v1782_v33  ;;  %1496 = vmatprep.subr.mxu1 %v788_v44 }
  0xaa   :  { %1460 = vmatpush3.msra.mxu0 %v1782_v33  ;;  %1497 = vmatpush3.msra.mxu1 %v788_v44 }
  0xab   :  { %1461 = vmatprep.subr.mxu0 %v1791_v39  ;;  %1498 = vmatprep.subr.mxu1 %v795_v63 }
  0xac   :  { %1462 = vmatpush3.msra.mxu0 %v1791_v39  ;;  %1499 = vmatpush3.msra.mxu1 %v795_v63 }
  0xad   :  { %1463 = vmatprep.subr.mxu0 %v1799_v42  ;;  %1500 = vmatprep.subr.mxu1 %v802_v6 }
  0xae   :  { %1464 = vmatpush3.msra.mxu0 %v1799_v42  ;;  %1501 = vmatpush3.msra.mxu1 %v802_v6 }
  0xaf   :  { %1465 = vmatprep.subr.mxu0 %v1818_v53  ;;  %1502 = vmatprep.subr.mxu1 %v809_v22 }
  0xb0   :  { %1466 = vmatpush3.msra.mxu0 %v1818_v53  ;;  %1503 = vmatpush3.msra.mxu1 %v809_v22 }
  0xb1   :  { %1467 = vmatprep.subr.mxu0 %v1829_v61  ;;  %1504 = vmatprep.subr.mxu1 %v816_v8 }
  0xb2   :  { %1508 = vmatprep.mubr.msk.f32.mxu1 %vm623_vm8, %v1909_v54  ;;  %1468 = vmatpush3.msra.mxu0 %v1829_v61 }
  0xb3   :  { %1505 = vmatpush3.msra.mxu1 %v816_v8  ;;  %1469 = vmatprep.subr.mxu0 %v1839_v3 }
  0xb4   :  { %1506 = vmatprep.subr.mxu1 %v823_v21  ;;  %1470 = vmatpush3.msra.mxu0 %v1839_v3 }
  0xb5   :  { %1507 = vmatpush3.msra.mxu1 %v823_v21  ;;  %1471 = vmatprep.subr.mxu0 %v1852_v13 }
  0xb6   :  { %1509 = vmatmul.mubr.msk.f32.vlgmr.msra.gmra.mxu1 %vm623_vm8, %v1937_v14  ;;  %1540 = vmatprep.subr.mxu1 %v1761_v19 }
  0xb7   :  { %1472 = vmatpush3.msra.mxu0 %v1852_v13  ;;  %1541 = vmatpush3.msra.mxu1 %v1761_v19 }
  0xb8   :  { %1566 = vmatprep.mubr.f32.mxu1 %v710_v31  ;;  %1473 = vmatprep.subr.mxu0 %v1864_v18 }
  0xb9   :  { %1542 = vmatprep.subr.mxu1 %v1768_v24  ;;  %1474 = vmatpush3.msra.mxu0 %v1864_v18 }
  0xba   :  { %1479 = vmatprep.mubr.f32.mxu0 %v712_v40  ;;  %1543 = vmatpush3.msra.mxu1 %v1768_v24 }
  0xbb   :  { %1475 = vmatprep.subr.mxu0 %v1875_v30  ;;  %1544 = vmatprep.subr.mxu1 %v1770_v25 }
  0xbc   :  { %1476 = vmatpush3.msra.mxu0 %v1875_v30  ;;  %1545 = vmatpush3.msra.mxu1 %v1770_v25 }
  0xbd   :  { %1477 = vmatprep.subr.mxu0 %v1887_v45  ;;  %1546 = vmatprep.subr.mxu1 %v1782_v33 }
  0xbe   :  { %1478 = vmatpush3.msra.mxu0 %v1887_v45  ;;  %1547 = vmatpush3.msra.mxu1 %v1782_v33 }
  0xbf   :  { %1480 = vmatmul.mubr.f32.vlgmr.msra.gmra.mxu0 %v722_v47  ;;  %1511 = vmatprep.subr.mxu0 %v1766_v23 }
  0xc0   :  { %1548 = vmatprep.subr.mxu1 %v1791_v39  ;;  %1512 = vmatpush3.msra.mxu0 %v1766_v23 }
  0xc1   :  { %1537 = vmatprep.mubr.f32.mxu0 %v709_v10  ;;  %1549 = vmatpush3.msra.mxu1 %v1791_v39 }
  0xc2   :  { %1513 = vmatprep.subr.mxu0 %v1777_v29  ;;  %1550 = vmatprep.subr.mxu1 %v1799_v42 }
  0xc3   :  { %1514 = vmatpush3.msra.mxu0 %v1777_v29  ;;  %1551 = vmatpush3.msra.mxu1 %v1799_v42 }
  0xc4   :  { %1515 = vmatprep.subr.mxu0 %v1789_v36  ;;  %1552 = vmatprep.subr.mxu1 %v1818_v53 }
  0xc5   :  { %1516 = vmatpush3.msra.mxu0 %v1789_v36  ;;  %1553 = vmatpush3.msra.mxu1 %v1818_v53  ;;  %v594_v36 = vpop.permute.xlu1 %593 }
  0xc6   :  { %1517 = vmatprep.subr.mxu0 %v1805_v46  ;;  %1554 = vmatprep.subr.mxu1 %v1829_v61  ;;  %vm596_vm10 = vcmp.eq.s32.totalorder %v594_v36, 1 }
  0xc7   :  { %1518 = vmatpush3.msra.mxu0 %v1805_v46  ;;  %1555 = vmatpush3.msra.mxu1 %v1829_v61 }
  0xc8   :  { %1519 = vmatprep.subr.mxu0 %v1816_v52  ;;  %1556 = vmatprep.subr.mxu1 %v1839_v3 }
  0xc9   :  { %1520 = vmatpush3.msra.mxu0 %v1816_v52  ;;  %1557 = vmatpush3.msra.mxu1 %v1839_v3  ;;  %v614_v46 = vpop.permute.xlu1 %613 }
  0xca   :  { %1521 = vmatprep.subr.mxu0 %v1824_v56  ;;  %1558 = vmatprep.subr.mxu1 %v1852_v13  ;;  %vm616_vm11 = vcmp.eq.s32.totalorder %v614_v46, 1 }
  0xcb   :  { %1522 = vmatpush3.msra.mxu0 %v1824_v56  ;;  %1559 = vmatpush3.msra.mxu1 %v1852_v13  ;;  %v1307_v56 = vld [vmem:[%s2101_s4 + $0x2] ss:$0 sm:$0xff] }
  0xcc   :  { %1523 = vmatprep.subr.mxu0 %v1837_v2  ;;  %1560 = vmatprep.subr.mxu1 %v1864_v18 }
  0xcd   :  { %1524 = vmatpush3.msra.mxu0 %v1837_v2  ;;  %1561 = vmatpush3.msra.mxu1 %v1864_v18 }
  0xce   :  { %1525 = vmatprep.subr.mxu0 %v1850_v11  ;;  %1562 = vmatprep.subr.mxu1 %v1875_v30 }
  0xcf   :  { %1526 = vmatpush3.msra.mxu0 %v1850_v11  ;;  %1563 = vmatpush3.msra.mxu1 %v1875_v30 }
  0xd0   :  { %1527 = vmatprep.subr.mxu0 %v1862_v17  ;;  %1564 = vmatprep.subr.mxu1 %v1887_v45 }
  0xd1   :  { %1528 = vmatpush3.msra.mxu0 %v1862_v17  ;;  %1565 = vmatpush3.msra.mxu1 %v1887_v45 }
  0xd2   :  { %1529 = vmatprep.subr.mxu0 %v1873_v27  ;;  %1567 = vmatmul.mubr.f32.vlgmr.msra.gmra.mxu1 %v720_v35 }
  0xd3   :  { %1598 = vmatprep.subr.mxu1 %v1761_v19  ;;  %1530 = vmatpush3.msra.mxu0 %v1873_v27 }
  0xd4   :  { %1599 = vmatpush3.msra.mxu1 %v1761_v19  ;;  %1624 = vmatprep.mubr.msk.f32.mxu1 %vm623_vm8, %v1909_v54 }
  0xd5   :  { %1531 = vmatprep.subr.mxu0 %v1884_v38  ;;  %1600 = vmatprep.subr.mxu1 %v1768_v24 }
  0xd6   :  { %1532 = vmatpush3.msra.mxu0 %v1884_v38  ;;  %1601 = vmatpush3.msra.mxu1 %v1768_v24 }
  0xd7   :  { %1533 = vmatprep.subr.mxu0 %v1898_v50  ;;  %1602 = vmatprep.subr.mxu1 %v1770_v25 }
  0xd8   :  { %1534 = vmatpush3.msra.mxu0 %v1898_v50  ;;  %1603 = vmatpush3.msra.mxu1 %v1770_v25 }
  0xd9   :  { %1535 = vmatprep.subr.mxu0 %v1913_v55  ;;  %1604 = vmatprep.subr.mxu1 %v1782_v33 }
  0xda   :  { %1536 = vmatpush3.msra.mxu0 %v1913_v55  ;;  %1605 = vmatpush3.msra.mxu1 %v1782_v33 }
  0xdb   :  { %1538 = vmatmul.mubr.f32.vlgmr.msra.gmra.mxu0 %v1949_v34  ;;  %1569 = vmatprep.subr.mxu0 %v1774_v28 }
  0xdc   :  { %1606 = vmatprep.subr.mxu1 %v1791_v39  ;;  %1570 = vmatpush3.msra.mxu0 %v1774_v28 }
  0xdd   :  { %1595 = vmatprep.mubr.msk.f32.mxu0 %vm623_vm8, %v1909_v54  ;;  %1607 = vmatpush3.msra.mxu1 %v1791_v39  ;;  %v591_v39 = vpop.permute.xlu0 %590 }
  0xde   :  { %1571 = vmatprep.subr.mxu0 %v1797_v41  ;;  %1608 = vmatprep.subr.mxu1 %v1799_v42  ;;  %vm595_vm12 = vcmp.eq.s32.totalorder %v591_v39, 1 }
  0xdf   :  { %1572 = vmatpush3.msra.mxu0 %v1797_v41  ;;  %1609 = vmatpush3.msra.mxu1 %v1799_v42 }
  0xe0   :  { %1573 = vmatprep.subr.mxu0 %v1812_v48  ;;  %1610 = vmatprep.subr.mxu1 %v1818_v53 }
  0xe1   :  { %1574 = vmatpush3.msra.mxu0 %v1812_v48  ;;  %1611 = vmatpush3.msra.mxu1 %v1818_v53  ;;  %v1306_v53 = vld [vmem:[%s2101_s4 + $0x1] ss:$0 sm:$0xff] }
  0xe2   :  { %1575 = vmatprep.subr.mxu0 %v1827_v60  ;;  %1612 = vmatprep.subr.mxu1 %v1829_v61 }
  0xe3   :  { %1576 = vmatpush3.msra.mxu0 %v1827_v60  ;;  %1613 = vmatpush3.msra.mxu1 %v1829_v61  ;;  %v611_v60 = vpop.permute.xlu0 %610 }
  0xe4   :  { %1577 = vmatprep.subr.mxu0 %v1834_v1  ;;  %1614 = vmatprep.subr.mxu1 %v1839_v3  ;;  %vm615_vm13 = vcmp.eq.s32.totalorder %v611_v60, 1 }
  0xe5   :  { %1578 = vmatpush3.msra.mxu0 %v1834_v1  ;;  %1615 = vmatpush3.msra.mxu1 %v1839_v3  ;;  %v606_v1 = vsel %vm596_vm10, %v1306_v53, %v1307_v56  ;;  %v1308_v3 = vld [vmem:[%s2101_s4] ss:$0 sm:$0xff]  ;;  %s1684_s4 = smov [#allocation5]  }
  0xe6   :  { %1579 = vmatprep.subr.mxu0 %v1845_v5  ;;  %1616 = vmatprep.subr.mxu1 %v1852_v13  ;;  %v622_v11 = vsel %vm616_vm11, %v1308_v3, %v606_v1  ;;  %s1284_s19 = sshll.u32 %s1684_s4, 4  ;;  %s1285_s19 = int_to_ptr.vmem [resolvable:$true] %s1284_s19 }
  0xe7   :  { %1580 = vmatpush3.msra.mxu0 %v1845_v5  ;;  %1617 = vmatpush3.msra.mxu1 %v1852_v13  ;;  %s1655_s20 = scalar_lea.vmem %s1285_s19, 256  ;;  %p1660_p6 = scmp.lt.s32.totalorder %s1285_s19, %s1285_s19 }
  0xe8   :  { %1581 = vmatprep.subr.mxu0 %v1859_v16  ;;  %1618 = vmatprep.subr.mxu1 %v1864_v18  ;;  %p1656_p5 = scmp.ne.s32.totalorder %s1285_s19, %s1655_s20  ;;  %p1661_p7 = scmp.lt.s32.totalorder %s1655_s20, %s1655_s20 }
  0xe9   :  { %1582 = vmatpush3.msra.mxu0 %v1859_v16  ;;  %1619 = vmatpush3.msra.mxu1 %v1864_v18  ;;  %v605_v16 = vsel %vm595_vm12, %v1306_v53, %v1307_v56 }
  0xea   :  { %1583 = vmatprep.subr.mxu0 %v1870_v26  ;;  %1620 = vmatprep.subr.mxu1 %v1875_v30  ;;  %p1662_p8 = por %p1661_p7, %p1660_p6 }
  0xeb   :  { %1584 = vmatpush3.msra.mxu0 %v1870_v26  ;;  %1621 = vmatpush3.msra.mxu1 %v1875_v30  ;;  %v621_v26 = vsel %vm615_vm13, %v1308_v3, %v605_v16 }
  0xec   :  { %1585 = vmatprep.subr.mxu0 %v1881_v37  ;;  %1622 = vmatprep.subr.mxu1 %v1887_v45  ;;  %p1663_p9 = pnand %p1662_p8, %p1656_p5 }
  0xed   :  { %1586 = vmatpush3.msra.mxu0 %v1881_v37  ;;  %1623 = vmatpush3.msra.mxu1 %v1887_v45 }
  0xee   :  { %1587 = vmatprep.subr.mxu0 %v1895_v49  ;;  %1625 = vmatmul.mubr.msk.f32.vlgmr.msra.gmra.mxu1 %vm623_vm8, %v1937_v14 }
  0xef   :  { %1588 = vmatpush3.msra.mxu0 %v1895_v49 }
  0xf0   :  { %1589 = vmatprep.subr.mxu0 %v1906_v51 }
  0xf1   :  { %1590 = vmatpush3.msra.mxu0 %v1906_v51 }
  0xf2   :  { %1591 = vmatprep.subr.mxu0 %v1919_v58 }
  0xf3   :  { %1592 = vmatpush3.msra.mxu0 %v1919_v58 }
  0xf4   :  { %1593 = vmatprep.subr.mxu0 %v1930_v4 }
  0xf5   :  { %1594 = vmatpush3.msra.mxu0 %v1930_v4 }
  0xf6   :  { %1596 = vmatmul.mubr.msk.f32.vlgmr.msra.gmra.mxu0 %vm623_vm8, %v1937_v14 }
 0x152   :  { %v1432_v23 = vpop.f32.mrf.mxu1 }
 0x154   :  { %v247_v25 = vpop.f32.mrf.mxu1 }
 0x157   :  { %v1442_v29 = vpop.f32.mrf.mxu1 }
 0x159   :  { %v408_v41 = vpop.f32.mrf.mxu1 }
 0x15b   :  { %v1427_v19 = vpop.f32.mrf.mxu0  ;;  %v1452_v48 = vpop.f32.mrf.mxu1 }
 0x15c   :  { %v254_v17 = vadd.f32 %v1432_v23, %v1427_v19 }
 0x15d   :  { %v161_v24 = vpop.f32.mrf.mxu0  ;;  %v568_v2 = vpop.f32.mrf.mxu1 }
 0x15e   :  { %v248_v30 = vadd.f32 %v247_v25, %v161_v24 }
 0x15f   :  { %v1437_v28 = vpop.f32.mrf.mxu0 }
 0x160   :  { %v335_v37 = vadd.f32 %v1437_v28, %v254_v17 }
 0x161   :  { %v327_v33 = vpop.f32.mrf.mxu0 }
 0x162   :  { %v328_v49 = vadd.f32 %v327_v33, %v248_v30  ;;  %v417_v51 = vadd.f32 %v1442_v29, %v335_v37 }
 0x163   :  { %v1447_v42 = vpop.f32.mrf.mxu0 }
 0x164   :  { %v409_v44 = vadd.f32 %v408_v41, %v328_v49  ;;  %v497_v59 = vadd.f32 %v1447_v42, %v417_v51 }
 0x165   :  { %v490_v52 = vpop.f32.mrf.mxu0 }
 0x166   :  { %v491_v4 = vadd.f32 %v490_v52, %v409_v44  ;;  %v575_v14 = vadd.f32 %v1452_v48, %v497_v59 }
 0x168   :  { %v569_v20 = vadd.f32 %v568_v2, %v491_v4 }
 0x176   :  { %v1510_v5 = vpop.f32.mrf.mxu1 }
 0x178   :  { %v860_v45 = vpop.f32.mrf.mxu1 }
 0x17f   :  { %v1481_v61 = vpop.f32.mrf.mxu0 }
 0x180   :  { %v725_v18 = vadd.f32 %v1481_v61, %v622_v11 }
 0x181   :  { %v714_v13 = vpop.f32.mrf.mxu0 }
 0x182   :  { %v715_v38 = vadd.f32 %v714_v13, %v621_v26  ;;  %v867_v50 = vadd.f32 %v1510_v5, %v725_v18 }
 0x184   :  { %v861_v55 = vadd.f32 %v860_v45, %v715_v38 }
 0x192   :  { %v1568_v12 = vpop.f32.mrf.mxu1 }
 0x194   :  { %v1057_v58 = vpop.f32.mrf.mxu1 }
 0x19b   :  { %v1539_v27 = vpop.f32.mrf.mxu0 }
 0x19c   :  { %v972_v54 = vadd.f32 %v1539_v27, %v867_v50 }
 0x19d   :  { %v964_v32 = vpop.f32.mrf.mxu0 }
 0x19e   :  { %v965_v57 = vadd.f32 %v964_v32, %v861_v55  ;;  %v1066_v62 = vadd.f32 %v1568_v12, %v972_v54 }
 0x1a0   :  { %v1058_v7 = vadd.f32 %v1057_v58, %v965_v57 }
 0x1ae   :  { %v1626_v63 = vpop.f32.mrf.mxu1 }
 0x1b0   :  { %v1265_v8 = vpop.f32.mrf.mxu1 }
 0x1b6   :  { %v1597_v0 = vpop.f32.mrf.mxu0 }
 0x1b7   :  { %v1182_v6 = vadd.f32 %v1597_v0, %v1066_v62 }
 0x1b8   :  { %v1175_v10 = vpop.f32.mrf.mxu0 }
 0x1b9   :  { %v1272_v22 = vadd.f32 %v1626_v63, %v1182_v6  ;;  %v1176_v15 = vadd.f32 %v1175_v10, %v1058_v7 }
 0x1bb   :  { %v1276_v31 = vadd.f32 %v1272_v22, %v575_v14  ;;  %v1266_v21 = vadd.f32 %v1265_v8, %v1176_v15 }
 0x1bd   :  { %1278 = vst [vmem:[#allocation5 + $0x8] sm:$0xff] %v1276_v31  ;;  %v1275_v34 = vadd.f32 %v1266_v21, %v569_v20 }
 0x1bf   :  { %1277 = vst [vmem:[#allocation5] sm:$0xff] %v1275_v34 }
 0x1c0   :  { %1666 = shalt.err (!%p1663_p9)
}
 0x1c1   :  { %1290 = dma.vmem_to_hbm [thread:$0]  %s1285_s19, 256, %s2103_s6, [#allocation4], %s1680_s24, %s1680_s24, %s1681_s25  }
 0x1c2   :  { %1677 = dma.done.wait [#allocation4], 256  }
 0x1c3   :  { %1678 = vsyncadd [#allocation4], 4294967040 }
 0x1c4   :  { %1294 = vsyncpa [#allocation3], 1 }
 0x1c5   :  { %1295 = vsyncpa [#allocation4], 1 }

// kernel: tpu_custom_call.1
= control target key start
LH: loop header
LB: loop body
LE: loop exit
PB: predicated region body
PF: predicated region fallthrough
CT: control target
= control target key end

     0   :  { %11 = vsyncpa [#allocation3], 0  ;;  %s2097_s0 = inlined_call_operand.vmem [shape: s32[16,1], index: 0, kind: input, shape index: {}]   ;;  %s2098_s1 = inlined_call_operand.vmem [shape: s32[16,1], index: 1, kind: input, shape index: {}]   ;;  %s2099_s2 = inlined_call_operand.vmem [shape: s32[16,1], index: 2, kind: input, shape index: {}]   ;;  %s2100_s3 = inlined_call_operand.hbm [shape: f32[104,128], index: 3, kind: input, shape index: {}]   ;;  %s2101_s4 = inlined_call_operand.vmem [shape: f32[3,128], index: 4, kind: input, shape index: {}]   ;;  %s2102_s5 = inlined_call_operand.vmem [shape: f32[8,128], index: 5, kind: input, shape index: {}]   ;;  %s2103_s6 = inlined_call_operand.hbm [shape: f32[16,128], index: 6, kind: output, shape index: {}]  }
   0x1   :  { %12 = vsyncpa [#allocation4], 0  ;;  %s1679_s21 = smov [#allocation2]  }
   0x2   :  { %s24_s22 = sshll.u32 %s1679_s21, 4  ;;  %s25_s22 = int_to_ptr.vmem [resolvable:$true] %s24_s22 }
   0x3   :  { %s1643_s23 = scalar_lea.vmem %s25_s22, 1664  ;;  %p1648_p1 = scmp.lt.s32.totalorder %s25_s22, %s25_s22 }
   0x4   :  { %p1644_p0 = scmp.ne.s32.totalorder %s25_s22, %s1643_s23  ;;  %p1649_p2 = scmp.lt.s32.totalorder %s1643_s23, %s1643_s23 }
   0x6   :  { %p1650_p3 = por %p1649_p2, %p1648_p1 }
   0x8   :  { %p1651_p4 = pnand %p1650_p3, %p1644_p0 }
   0xa   :  { %1654 = shalt.err (!%p1651_p4)
}
   0xb   :  { %s1680_s24 = smov 128   ;;  %s1681_s25 = smov 8  }
   0xc   :  { %30 = dma.hbm_to_vmem [thread:$0]  %s2100_s3, 1664, %s25_s22, [#allocation3], %s1680_s24, %s1680_s24, %s1681_s25  }
   0xd   :  { %1675 = dma.done.wait [#allocation3], 1664  }
   0xe   :  { %1676 = vsyncadd [#allocation3], 4294965632  ;;  %v1682_v0 = vmov 0   ;;  %v67_v1 = vld [vmem:[%s2099_s2] sm:$0xff]  ;;  %v579_v4 = vld [vmem:[%s2098_s1 + $0x8] sm:$0xff]  ;;  %v40_v18 = vlaneseq  ;;  %vm82_vm4 = vcmask 64512  }
   0xf   :  { %1633 = vset.pattern.permute.xlu0 %v1682_v0  ;;  %1634 = vset.pattern.permute.xlu1 %v1682_v0  ;;  %v578_v2 = vld [vmem:[%s2098_s1] sm:$0xff]  ;;  %v68_v5 = vld [vmem:[%s2099_s2 + $0x8] sm:$0xff]  ;;  %vm584_vm1 = vcmp.eq.s32.totalorder %v579_v4, 1  ;;  %vm581_vm3 = vcmp.eq.s32.totalorder %v579_v4, 0  ;;  %v65_v20 = vld [vmem:[#allocation2 + $0x58] sm:$0xff]  ;;  %v1683_v31 = vmov 0.0  }
  0x10   :  { %70 = vperm.xlu0 %1633, %v67_v1   ;;  %v38_v3 = vld [vmem:[%s2097_s0] sm:$0xff]  ;;  %vm583_vm0 = vcmp.eq.s32.totalorder %v578_v2, 1  ;;  %v39_v7 = vld [vmem:[%s2097_s0 + $0x8] sm:$0xff]  ;;  %vm580_vm2 = vcmp.eq.s32.totalorder %v578_v2, 0  ;;  %v588_v11 = vsel %vm584_vm1, 1, %v1682_v0  ;;  %v608_v15 = vsel %vm581_vm3, 1, %v1682_v0 }
  0x11   :  { %43 = vperm.xlu1 %1634, %v38_v3   ;;  %v81_v6 = vld [vmem:[%s2102_s5] sm:$0xff]  ;;  %v587_v10 = vsel %vm583_vm0, 1, %v1682_v0  ;;  %v607_v14 = vsel %vm580_vm2, 1, %v1682_v0  ;;  %v64_v21 = vld [vmem:[#allocation2 + $0x50] sm:$0xff]  ;;  %v1763_v22 = vand.u32 127, %v40_v18  ;;  %v1768_v24 = vand.u32 4294901760, %v65_v20 }
  0x12   :  { %v1747_v8 = vand.u32 4294901760, %v81_v6  ;;  %v66_v17 = vld [vmem:[#allocation2 + $0x60] sm:$0xff]  ;;  %v1770_v25 = vand.u32 4294901760, %v64_v21  ;;  %v63_v26 = vld [vmem:[#allocation2 + $0x48] sm:$0xff]  ;;  %v61_v34 = vld [vmem:[#allocation2 + $0x38] sm:$0xff]  ;;  %vm623_vm8 = vcmask 850944  }
  0x13   :  { %v1761_v19 = vand.u32 4294901760, %v66_v17  ;;  %v1777_v29 = vsub.f32 %v65_v20, %v1768_v24  ;;  %v62_v30 = vld [vmem:[#allocation2 + $0x40] sm:$0xff]  ;;  %v1782_v33 = vand.u32 4294901760, %v63_v26  ;;  %v1799_v42 = vand.u32 4294901760, %v61_v34  ;;  %v60_v43 = vld [vmem:[#allocation2 + $0x30] sm:$0xff]  ;;  %v59_v49 = vld [vmem:[#allocation2 + $0x28] sm:$0xff] }
  0x14   :  { %73 = vperm.xlu0 %1633, %v68_v5   ;;  %v1750_v9 = vsub.f32 %v81_v6, %v1747_v8  ;;  %1423 = vmatprep.subr.mxu0 %v1747_v8  ;;  %v1789_v36 = vsub.f32 %v64_v21, %v1770_v25  ;;  %v1791_v39 = vand.u32 4294901760, %v62_v30  ;;  %v1818_v53 = vand.u32 4294901760, %v60_v43  ;;  %v58_v57 = vld [vmem:[#allocation2 + $0x20] sm:$0xff]  ;;  %v57_v63 = vld [vmem:[#allocation2 + $0x18] sm:$0xff]  ;;  %v56_v6 = vld [vmem:[#allocation2 + $0x10] sm:$0xff] }
  0x15   :  { %46 = vperm.xlu1 %1634, %v39_v7   ;;  %1424 = vmatpush3.msra.mxu0 %v1747_v8  ;;  %v1766_v23 = vsub.f32 %v66_v17, %v1761_v19  ;;  %v1797_v41 = vand.u32 4294901760, %v1777_v29  ;;  %v1805_v46 = vsub.f32 %v63_v26, %v1782_v33  ;;  %v1824_v56 = vsub.f32 %v61_v34, %v1799_v42  ;;  %v54_v34 = vld [vmem:[#allocation2] sm:$0xff] }
  0x16   :  { %v1755_v12 = vand.u32 4294901760, %v1750_v9  ;;  %1433 = vmatprep.subr.mxu0 %v1750_v9  ;;  %v1812_v48 = vand.u32 4294901760, %v1789_v36  ;;  %v1816_v52 = vsub.f32 %v62_v30, %v1791_v39  ;;  %v1829_v61 = vand.u32 4294901760, %v59_v49 }
  0x17   :  { %v1774_v28 = vand.u32 4294901760, %v1766_v23  ;;  %v745_v55 = vsub.f32 %v1777_v29, %v1797_v41  ;;  %v1827_v60 = vand.u32 4294901760, %v1805_v46  ;;  %v1837_v2 = vsub.f32 %v60_v43, %v1818_v53 }
  0x18   :  { %590 = vperm.xlu0 %1633, %v587_v10   ;;  %v209_v13 = vsub.f32 %v1750_v9, %v1755_v12  ;;  %v752_v62 = vsub.f32 %v1789_v36, %v1812_v48  ;;  %v1834_v1 = vand.u32 4294901760, %v1816_v52  ;;  %v1839_v3 = vand.u32 4294901760, %v58_v57 }
  0x19   :  { %593 = vperm.xlu1 %1634, %v588_v11   ;;  %v738_v40 = vsub.f32 %v1766_v23, %v1774_v28  ;;  %v746_v4 = vand.u32 4294901760, %v745_v55  ;;  %v1845_v5 = vand.u32 4294901760, %v1824_v56  ;;  %v759_v10 = vsub.f32 %v1805_v46, %v1827_v60 }
  0x1a   :  { %v210_v16 = vand.u32 4294901760, %v209_v13  ;;  %v1850_v11 = vsub.f32 %v59_v49, %v1829_v61  ;;  %v1852_v13 = vand.u32 4294901760, %v57_v63  ;;  %v1862_v17 = vsub.f32 %v58_v57, %v1839_v3 }
  0x1b   :  { %v739_v54 = vand.u32 4294901760, %v738_v40  ;;  %v1864_v18 = vand.u32 4294901760, %v56_v6  ;;  %v773_v20 = vsub.f32 %v1824_v56, %v1845_v5  ;;  %v760_v21 = vand.u32 4294901760, %v759_v10 }
  0x1c   :  { %610 = vperm.xlu0 %1633, %v607_v14   ;;  %1428 = vmatprep.subr.mxu1 %v210_v16  ;;  %v753_v14 = vand.u32 4294901760, %v752_v62  ;;  %v1870_v26 = vand.u32 4294901760, %v1850_v11 }
  0x1d   :  { %613 = vperm.xlu1 %1634, %v608_v15   ;;  %1429 = vmatpush3.msra.mxu1 %v210_v16  ;;  %v55_v15 = vld [vmem:[#allocation2 + $0x8] sm:$0xff]  ;;  %v1859_v16 = vand.u32 4294901760, %v1837_v2  ;;  %v774_v43 = vand.u32 4294901760, %v773_v20 }
  0x1e   :  { %1438 = vmatprep.subr.mxu1 %v1747_v8  ;;  %v1875_v30 = vand.u32 4294901760, %v55_v15 }
  0x8b   :  { %v71_v27 = vpop.permute.xlu0 %70 }
  0x8c   :  { %vm75_vm5 = vcmp.eq.s32.totalorder %v1763_v22, %v71_v27  ;;  %v1873_v27 = vsub.f32 %v57_v63, %v1852_v13  ;;  %v44_v40 = vpop.permute.xlu1 %43 }
  0x8d   :  { %v1780_v32 = vsel %vm75_vm5, 1.0, %v1683_v31  ;;  %vm48_vm7 = vcmp.eq.s32.totalorder %v1763_v22, %v44_v40 }
  0x8e   :  { %v84_v35 = vsel %vm82_vm4, %v1780_v32, 0  ;;  %1430 = vmatprep.mubr.msk.f32.mxu1 %vm82_vm4, %v1780_v32  ;;  %v1895_v49 = vand.u32 4294901760, %v1873_v27 }
  0x8f   :  { %v156_v37 = vsub.f32 %v84_v35, %v84_v35  ;;  %v74_v38 = vpop.permute.xlu0 %73  ;;  %v780_v35 = vsub.f32 %v1837_v2, %v1859_v16 }
  0x90   :  { %vm76_vm6 = vcmp.eq.s32.totalorder %v1763_v22, %v74_v38  ;;  %v1884_v38 = vsub.f32 %v56_v6, %v1864_v18  ;;  %v801_v57 = vsub.f32 %v1873_v27, %v1895_v49  ;;  %v47_v62 = vpop.permute.xlu1 %46 }
  0x91   :  { %v1802_v44 = vsel %vm76_vm6, 1.0, %v1683_v31  ;;  %v157_v45 = vand.u32 4294901760, %v156_v37  ;;  %vm49_vm9 = vcmp.eq.s32.totalorder %v1763_v22, %v47_v62 }
  0x92   :  { %v87_v47 = vsel %vm82_vm4, %v1802_v44, 0  ;;  %1431 = vmatmul.mubr.msk.f32.vlgmr.msra.gmra.mxu1 %vm82_vm4, %v1802_v44  ;;  %v802_v6 = vand.u32 4294901760, %v801_v57 }
  0x93   :  { %v166_v50 = vsub.f32 %v87_v47, %v87_v47  ;;  %1440 = vmatprep.mubr.f32.mxu1 %v157_v45  ;;  %1439 = vmatpush3.msra.mxu1 %v1747_v8  ;;  %v158_v51 = vsub.f32 %v156_v37, %v157_v45  ;;  %v1887_v45 = vand.u32 4294901760, %v54_v34  ;;  %v787_v47 = vsub.f32 %v1850_v11, %v1870_v26 }
  0x94   :  { %1448 = vmatprep.subr.mxu1 %v1747_v8 }
  0x95   :  { %v159_v58 = vand.u32 4294901760, %v158_v51  ;;  %v167_v59 = vand.u32 4294901760, %v166_v50  ;;  %v1906_v51 = vand.u32 4294901760, %v1884_v38  ;;  %v1913_v55 = vsub.f32 %v54_v34, %v1887_v45 }
  0x97   :  { %1425 = vmatprep.mubr.f32.mxu0 %v159_v58  ;;  %1441 = vmatmul.mubr.f32.vlgmr.msra.gmra.mxu1 %v167_v59  ;;  %v168_v0 = vsub.f32 %v166_v50, %v167_v59 }
  0x98   :  { %1450 = vmatprep.mubr.msk.f32.mxu1 %vm82_vm4, %v1780_v32  ;;  %1449 = vmatpush3.msra.mxu1 %v1747_v8  ;;  %v766_v8 = vsub.f32 %v1816_v52, %v1834_v1 }
  0x99   :  { %1482 = vmatprep.subr.mxu1 %v739_v54  ;;  %v169_v7 = vand.u32 4294901760, %v168_v0  ;;  %v808_v0 = vsub.f32 %v1884_v38, %v1906_v51 }
  0x9b   :  { %1426 = vmatmul.mubr.f32.vlgmr.msra.gmra.mxu0 %v169_v7  ;;  %1451 = vmatmul.mubr.msk.f32.vlgmr.msra.gmra.mxu1 %vm82_vm4, %v1802_v44  ;;  %v809_v22 = vand.u32 4294901760, %v808_v0 }
  0x9c   :  { %1434 = vmatpush3.msra.mxu0 %v1750_v9  ;;  %1483 = vmatpush3.msra.mxu1 %v739_v54  ;;  %v767_v9 = vand.u32 4294901760, %v766_v8  ;;  %v1909_v54 = vsel %vm48_vm7, 1.0, %v1683_v31 }
  0x9d   :  { %1435 = vmatprep.mubr.f32.mxu0 %v156_v37  ;;  %1484 = vmatprep.subr.mxu1 %v746_v4  ;;  %v1881_v37 = vand.u32 4294901760, %v1862_v17  ;;  %v625_v59 = vsel %vm623_vm8, %v1909_v54, 0 }
  0x9e   :  { %1485 = vmatpush3.msra.mxu1 %v746_v4  ;;  %1443 = vmatprep.subr.mxu0 %v1755_v12  ;;  %v1930_v4 = vand.u32 4294901760, %v1913_v55  ;;  %v709_v10 = vsub.f32 %v625_v59, %v625_v59 }
  0x9f   :  { %1486 = vmatprep.subr.mxu1 %v753_v14  ;;  %1436 = vmatmul.mubr.f32.vlgmr.msra.gmra.mxu0 %v166_v50  ;;  %v1898_v50 = vsub.f32 %v55_v15, %v1875_v30 }
  0xa0   :  { %1444 = vmatpush3.msra.mxu0 %v1755_v12  ;;  %1487 = vmatpush3.msra.mxu1 %v753_v14  ;;  %v781_v12 = vand.u32 4294901760, %v780_v35  ;;  %v1937_v14 = vsel %vm49_vm9, 1.0, %v1683_v31  ;;  %v822_v15 = vsub.f32 %v1913_v55, %v1930_v4  ;;  %v710_v31 = vand.u32 4294901760, %v709_v10 }
  0xa1   :  { %1445 = vmatprep.mubr.msk.f32.mxu0 %vm82_vm4, %v1780_v32  ;;  %1488 = vmatprep.subr.mxu1 %v760_v21  ;;  %v794_v32 = vsub.f32 %v1862_v17, %v1881_v37  ;;  %v1919_v58 = vand.u32 4294901760, %v1898_v50  ;;  %v628_v20 = vsel %vm623_vm8, %v1937_v14, 0 }
  0xa2   :  { %1489 = vmatpush3.msra.mxu1 %v760_v21  ;;  %1453 = vmatprep.subr.mxu0 %v1761_v19  ;;  %v823_v21 = vand.u32 4294901760, %v822_v15  ;;  %v1949_v34 = vsub.f32 %v628_v20, %v628_v20 }
  0xa3   :  { %1490 = vmatprep.subr.mxu1 %v767_v9  ;;  %1446 = vmatmul.mubr.msk.f32.vlgmr.msra.gmra.mxu0 %vm82_vm4, %v1802_v44  ;;  %v788_v44 = vand.u32 4294901760, %v787_v47  ;;  %v795_v63 = vand.u32 4294901760, %v794_v32  ;;  %v815_v7 = vsub.f32 %v1898_v50, %v1919_v58 }
  0xa4   :  { %1454 = vmatpush3.msra.mxu0 %v1761_v19  ;;  %1491 = vmatpush3.msra.mxu1 %v767_v9  ;;  %v711_v9 = vsub.f32 %v709_v10, %v710_v31  ;;  %v720_v35 = vand.u32 4294901760, %v1949_v34 }
  0xa5   :  { %1455 = vmatprep.subr.mxu0 %v1768_v24  ;;  %1492 = vmatprep.subr.mxu1 %v774_v43  ;;  %v816_v8 = vand.u32 4294901760, %v815_v7 }
  0xa6   :  { %1456 = vmatpush3.msra.mxu0 %v1768_v24  ;;  %1493 = vmatpush3.msra.mxu1 %v774_v43  ;;  %v712_v40 = vand.u32 4294901760, %v711_v9  ;;  %v721_v43 = vsub.f32 %v1949_v34, %v720_v35 }
  0xa7   :  { %1457 = vmatprep.subr.mxu0 %v1770_v25  ;;  %1494 = vmatprep.subr.mxu1 %v781_v12 }
  0xa8   :  { %1458 = vmatpush3.msra.mxu0 %v1770_v25  ;;  %1495 = vmatpush3.msra.mxu1 %v781_v12  ;;  %v722_v47 = vand.u32 4294901760, %v721_v43 }
  0xa9   :  { %1459 = vmatprep.subr.mxu0 %v1782_v33  ;;  %1496 = vmatprep.subr.mxu1 %v788_v44 }
  0xaa   :  { %1460 = vmatpush3.msra.mxu0 %v1782_v33  ;;  %1497 = vmatpush3.msra.mxu1 %v788_v44 }
  0xab   :  { %1461 = vmatprep.subr.mxu0 %v1791_v39  ;;  %1498 = vmatprep.subr.mxu1 %v795_v63 }
  0xac   :  { %1462 = vmatpush3.msra.mxu0 %v1791_v39  ;;  %1499 = vmatpush3.msra.mxu1 %v795_v63 }
  0xad   :  { %1463 = vmatprep.subr.mxu0 %v1799_v42  ;;  %1500 = vmatprep.subr.mxu1 %v802_v6 }
  0xae   :  { %1464 = vmatpush3.msra.mxu0 %v1799_v42  ;;  %1501 = vmatpush3.msra.mxu1 %v802_v6 }
  0xaf   :  { %1465 = vmatprep.subr.mxu0 %v1818_v53  ;;  %1502 = vmatprep.subr.mxu1 %v809_v22 }
  0xb0   :  { %1466 = vmatpush3.msra.mxu0 %v1818_v53  ;;  %1503 = vmatpush3.msra.mxu1 %v809_v22 }
  0xb1   :  { %1467 = vmatprep.subr.mxu0 %v1829_v61  ;;  %1504 = vmatprep.subr.mxu1 %v816_v8 }
  0xb2   :  { %1508 = vmatprep.mubr.msk.f32.mxu1 %vm623_vm8, %v1909_v54  ;;  %1468 = vmatpush3.msra.mxu0 %v1829_v61 }
  0xb3   :  { %1505 = vmatpush3.msra.mxu1 %v816_v8  ;;  %1469 = vmatprep.subr.mxu0 %v1839_v3 }
  0xb4   :  { %1506 = vmatprep.subr.mxu1 %v823_v21  ;;  %1470 = vmatpush3.msra.mxu0 %v1839_v3 }
  0xb5   :  { %1507 = vmatpush3.msra.mxu1 %v823_v21  ;;  %1471 = vmatprep.subr.mxu0 %v1852_v13 }
  0xb6   :  { %1509 = vmatmul.mubr.msk.f32.vlgmr.msra.gmra.mxu1 %vm623_vm8, %v1937_v14  ;;  %1540 = vmatprep.subr.mxu1 %v1761_v19 }
  0xb7   :  { %1472 = vmatpush3.msra.mxu0 %v1852_v13  ;;  %1541 = vmatpush3.msra.mxu1 %v1761_v19 }
  0xb8   :  { %1566 = vmatprep.mubr.f32.mxu1 %v710_v31  ;;  %1473 = vmatprep.subr.mxu0 %v1864_v18 }
  0xb9   :  { %1542 = vmatprep.subr.mxu1 %v1768_v24  ;;  %1474 = vmatpush3.msra.mxu0 %v1864_v18 }
  0xba   :  { %1479 = vmatprep.mubr.f32.mxu0 %v712_v40  ;;  %1543 = vmatpush3.msra.mxu1 %v1768_v24 }
  0xbb   :  { %1475 = vmatprep.subr.mxu0 %v1875_v30  ;;  %1544 = vmatprep.subr.mxu1 %v1770_v25 }
  0xbc   :  { %1476 = vmatpush3.msra.mxu0 %v1875_v30  ;;  %1545 = vmatpush3.msra.mxu1 %v1770_v25 }
  0xbd   :  { %1477 = vmatprep.subr.mxu0 %v1887_v45  ;;  %1546 = vmatprep.subr.mxu1 %v1782_v33 }
  0xbe   :  { %1478 = vmatpush3.msra.mxu0 %v1887_v45  ;;  %1547 = vmatpush3.msra.mxu1 %v1782_v33 }
  0xbf   :  { %1480 = vmatmul.mubr.f32.vlgmr.msra.gmra.mxu0 %v722_v47  ;;  %1511 = vmatprep.subr.mxu0 %v1766_v23 }
  0xc0   :  { %1548 = vmatprep.subr.mxu1 %v1791_v39  ;;  %1512 = vmatpush3.msra.mxu0 %v1766_v23 }
  0xc1   :  { %1537 = vmatprep.mubr.f32.mxu0 %v709_v10  ;;  %1549 = vmatpush3.msra.mxu1 %v1791_v39 }
  0xc2   :  { %1513 = vmatprep.subr.mxu0 %v1777_v29  ;;  %1550 = vmatprep.subr.mxu1 %v1799_v42 }
  0xc3   :  { %1514 = vmatpush3.msra.mxu0 %v1777_v29  ;;  %1551 = vmatpush3.msra.mxu1 %v1799_v42 }
  0xc4   :  { %1515 = vmatprep.subr.mxu0 %v1789_v36  ;;  %1552 = vmatprep.subr.mxu1 %v1818_v53 }
  0xc5   :  { %1516 = vmatpush3.msra.mxu0 %v1789_v36  ;;  %1553 = vmatpush3.msra.mxu1 %v1818_v53  ;;  %v594_v36 = vpop.permute.xlu1 %593 }
  0xc6   :  { %1517 = vmatprep.subr.mxu0 %v1805_v46  ;;  %1554 = vmatprep.subr.mxu1 %v1829_v61  ;;  %vm596_vm10 = vcmp.eq.s32.totalorder %v594_v36, 1 }
  0xc7   :  { %1518 = vmatpush3.msra.mxu0 %v1805_v46  ;;  %1555 = vmatpush3.msra.mxu1 %v1829_v61 }
  0xc8   :  { %1519 = vmatprep.subr.mxu0 %v1816_v52  ;;  %1556 = vmatprep.subr.mxu1 %v1839_v3 }
  0xc9   :  { %1520 = vmatpush3.msra.mxu0 %v1816_v52  ;;  %1557 = vmatpush3.msra.mxu1 %v1839_v3  ;;  %v614_v46 = vpop.permute.xlu1 %613 }
  0xca   :  { %1521 = vmatprep.subr.mxu0 %v1824_v56  ;;  %1558 = vmatprep.subr.mxu1 %v1852_v13  ;;  %vm616_vm11 = vcmp.eq.s32.totalorder %v614_v46, 1 }
  0xcb   :  { %1522 = vmatpush3.msra.mxu0 %v1824_v56  ;;  %1559 = vmatpush3.msra.mxu1 %v1852_v13  ;;  %v1307_v56 = vld [vmem:[%s2101_s4 + $0x2] ss:$0 sm:$0xff] }
  0xcc   :  { %1523 = vmatprep.subr.mxu0 %v1837_v2  ;;  %1560 = vmatprep.subr.mxu1 %v1864_v18 }
  0xcd   :  { %1524 = vmatpush3.msra.mxu0 %v1837_v2  ;;  %1561 = vmatpush3.msra.mxu1 %v1864_v18 }
  0xce   :  { %1525 = vmatprep.subr.mxu0 %v1850_v11  ;;  %1562 = vmatprep.subr.mxu1 %v1875_v30 }
  0xcf   :  { %1526 = vmatpush3.msra.mxu0 %v1850_v11  ;;  %1563 = vmatpush3.msra.mxu1 %v1875_v30 }
  0xd0   :  { %1527 = vmatprep.subr.mxu0 %v1862_v17  ;;  %1564 = vmatprep.subr.mxu1 %v1887_v45 }
  0xd1   :  { %1528 = vmatpush3.msra.mxu0 %v1862_v17  ;;  %1565 = vmatpush3.msra.mxu1 %v1887_v45 }
  0xd2   :  { %1529 = vmatprep.subr.mxu0 %v1873_v27  ;;  %1567 = vmatmul.mubr.f32.vlgmr.msra.gmra.mxu1 %v720_v35 }
  0xd3   :  { %1598 = vmatprep.subr.mxu1 %v1761_v19  ;;  %1530 = vmatpush3.msra.mxu0 %v1873_v27 }
  0xd4   :  { %1599 = vmatpush3.msra.mxu1 %v1761_v19  ;;  %1624 = vmatprep.mubr.msk.f32.mxu1 %vm623_vm8, %v1909_v54 }
  0xd5   :  { %1531 = vmatprep.subr.mxu0 %v1884_v38  ;;  %1600 = vmatprep.subr.mxu1 %v1768_v24 }
  0xd6   :  { %1532 = vmatpush3.msra.mxu0 %v1884_v38  ;;  %1601 = vmatpush3.msra.mxu1 %v1768_v24 }
  0xd7   :  { %1533 = vmatprep.subr.mxu0 %v1898_v50  ;;  %1602 = vmatprep.subr.mxu1 %v1770_v25 }
  0xd8   :  { %1534 = vmatpush3.msra.mxu0 %v1898_v50  ;;  %1603 = vmatpush3.msra.mxu1 %v1770_v25 }
  0xd9   :  { %1535 = vmatprep.subr.mxu0 %v1913_v55  ;;  %1604 = vmatprep.subr.mxu1 %v1782_v33 }
  0xda   :  { %1536 = vmatpush3.msra.mxu0 %v1913_v55  ;;  %1605 = vmatpush3.msra.mxu1 %v1782_v33 }
  0xdb   :  { %1538 = vmatmul.mubr.f32.vlgmr.msra.gmra.mxu0 %v1949_v34  ;;  %1569 = vmatprep.subr.mxu0 %v1774_v28 }
  0xdc   :  { %1606 = vmatprep.subr.mxu1 %v1791_v39  ;;  %1570 = vmatpush3.msra.mxu0 %v1774_v28 }
  0xdd   :  { %1595 = vmatprep.mubr.msk.f32.mxu0 %vm623_vm8, %v1909_v54  ;;  %1607 = vmatpush3.msra.mxu1 %v1791_v39  ;;  %v591_v39 = vpop.permute.xlu0 %590 }
  0xde   :  { %1571 = vmatprep.subr.mxu0 %v1797_v41  ;;  %1608 = vmatprep.subr.mxu1 %v1799_v42  ;;  %vm595_vm12 = vcmp.eq.s32.totalorder %v591_v39, 1 }
  0xdf   :  { %1572 = vmatpush3.msra.mxu0 %v1797_v41  ;;  %1609 = vmatpush3.msra.mxu1 %v1799_v42 }
  0xe0   :  { %1573 = vmatprep.subr.mxu0 %v1812_v48  ;;  %1610 = vmatprep.subr.mxu1 %v1818_v53 }
  0xe1   :  { %1574 = vmatpush3.msra.mxu0 %v1812_v48  ;;  %1611 = vmatpush3.msra.mxu1 %v1818_v53  ;;  %v1306_v53 = vld [vmem:[%s2101_s4 + $0x1] ss:$0 sm:$0xff] }
  0xe2   :  { %1575 = vmatprep.subr.mxu0 %v1827_v60  ;;  %1612 = vmatprep.subr.mxu1 %v1829_v61 }
  0xe3   :  { %1576 = vmatpush3.msra.mxu0 %v1827_v60  ;;  %1613 = vmatpush3.msra.mxu1 %v1829_v61  ;;  %v611_v60 = vpop.permute.xlu0 %610 }
  0xe4   :  { %1577 = vmatprep.subr.mxu0 %v1834_v1  ;;  %1614 = vmatprep.subr.mxu1 %v1839_v3  ;;  %vm615_vm13 = vcmp.eq.s32.totalorder %v611_v60, 1 }
  0xe5   :  { %1578 = vmatpush3.msra.mxu0 %v1834_v1  ;;  %1615 = vmatpush3.msra.mxu1 %v1839_v3  ;;  %v606_v1 = vsel %vm596_vm10, %v1306_v53, %v1307_v56  ;;  %v1308_v3 = vld [vmem:[%s2101_s4] ss:$0 sm:$0xff]  ;;  %s1684_s4 = smov [#allocation5]  }
  0xe6   :  { %1579 = vmatprep.subr.mxu0 %v1845_v5  ;;  %1616 = vmatprep.subr.mxu1 %v1852_v13  ;;  %v622_v11 = vsel %vm616_vm11, %v1308_v3, %v606_v1  ;;  %s1284_s19 = sshll.u32 %s1684_s4, 4  ;;  %s1285_s19 = int_to_ptr.vmem [resolvable:$true] %s1284_s19 }
  0xe7   :  { %1580 = vmatpush3.msra.mxu0 %v1845_v5  ;;  %1617 = vmatpush3.msra.mxu1 %v1852_v13  ;;  %s1655_s20 = scalar_lea.vmem %s1285_s19, 256  ;;  %p1660_p6 = scmp.lt.s32.totalorder %s1285_s19, %s1285_s19 }
  0xe8   :  { %1581 = vmatprep.subr.mxu0 %v1859_v16  ;;  %1618 = vmatprep.subr.mxu1 %v1864_v18  ;;  %p1656_p5 = scmp.ne.s32.totalorder %s1285_s19, %s1655_s20  ;;  %p1661_p7 = scmp.lt.s32.totalorder %s1655_s20, %s1655_s20 }
  0xe9   :  { %1582 = vmatpush3.msra.mxu0 %v1859_v16  ;;  %1619 = vmatpush3.msra.mxu1 %v1864_v18  ;;  %v605_v16 = vsel %vm595_vm12, %v1306_v53, %v1307_v56 }
  0xea   :  { %1583 = vmatprep.subr.mxu0 %v1870_v26  ;;  %1620 = vmatprep.subr.mxu1 %v1875_v30  ;;  %p1662_p8 = por %p1661_p7, %p1660_p6 }
  0xeb   :  { %1584 = vmatpush3.msra.mxu0 %v1870_v26  ;;  %1621 = vmatpush3.msra.mxu1 %v1875_v30  ;;  %v621_v26 = vsel %vm615_vm13, %v1308_v3, %v605_v16 }
  0xec   :  { %1585 = vmatprep.subr.mxu0 %v1881_v37  ;;  %1622 = vmatprep.subr.mxu1 %v1887_v45  ;;  %p1663_p9 = pnand %p1662_p8, %p1656_p5 }
  0xed   :  { %1586 = vmatpush3.msra.mxu0 %v1881_v37  ;;  %1623 = vmatpush3.msra.mxu1 %v1887_v45 }
  0xee   :  { %1587 = vmatprep.subr.mxu0 %v1895_v49  ;;  %1625 = vmatmul.mubr.msk.f32.vlgmr.msra.gmra.mxu1 %vm623_vm8, %v1937_v14 }
  0xef   :  { %1588 = vmatpush3.msra.mxu0 %v1895_v49 }
  0xf0   :  { %1589 = vmatprep.subr.mxu0 %v1906_v51 }
  0xf1   :  { %1590 = vmatpush3.msra.mxu0 %v1906_v51 }
  0xf2   :  { %1591 = vmatprep.subr.mxu0 %v1919_v58 }
  0xf3   :  { %1592 = vmatpush3.msra.mxu0 %v1919_v58 }
  0xf4   :  { %1593 = vmatprep.subr.mxu0 %v1930_v4 }
  0xf5   :  { %1594 = vmatpush3.msra.mxu0 %v1930_v4 }
  0xf6   :  { %1596 = vmatmul.mubr.msk.f32.vlgmr.msra.gmra.mxu0 %vm623_vm8, %v1937_v14 }
 0x152   :  { %v1432_v23 = vpop.f32.mrf.mxu1 }
 0x154   :  { %v247_v25 = vpop.f32.mrf.mxu1 }
 0x157   :  { %v1442_v29 = vpop.f32.mrf.mxu1 }
 0x159   :  { %v408_v41 = vpop.f32.mrf.mxu1 }
 0x15b   :  { %v1427_v19 = vpop.f32.mrf.mxu0  ;;  %v1452_v48 = vpop.f32.mrf.mxu1 }
 0x15c   :  { %v254_v17 = vadd.f32 %v1432_v23, %v1427_v19 }
 0x15d   :  { %v161_v24 = vpop.f32.mrf.mxu0  ;;  %v568_v2 = vpop.f32.mrf.mxu1 }
 0x15e   :  { %v248_v30 = vadd.f32 %v247_v25, %v161_v24 }
 0x15f   :  { %v1437_v28 = vpop.f32.mrf.mxu0 }
 0x160   :  { %v335_v37 = vadd.f32 %v1437_v28, %v254_v17 }
 0x161   :  { %v327_v33 = vpop.f32.mrf.mxu0 }
 0x162   :  { %v328_v49 = vadd.f32 %v327_v33, %v248_v30  ;;  %v417_v51 = vadd.f32 %v1442_v29, %v335_v37 }
 0x163   :  { %v1447_v42 = vpop.f32.mrf.mxu0 }
 0x164   :  { %v409_v44 = vadd.f32 %v408_v41, %v328_v49  ;;  %v497_v59 = vadd.f32 %v1447_v42, %v417_v51 }
 0x165   :  { %v490_v52 = vpop.f32.mrf.mxu0 }
 0x166   :  { %v491_v4 = vadd.f32 %v490_v52, %v409_v44  ;;  %v575_v14 = vadd.f32 %v1452_v48, %v497_v59 }
 0x168   :  { %v569_v20 = vadd.f32 %v568_v2, %v491_v4 }
 0x176   :  { %v1510_v5 = vpop.f32.mrf.mxu1 }
 0x178   :  { %v860_v45 = vpop.f32.mrf.mxu1 }
 0x17f   :  { %v1481_v61 = vpop.f32.mrf.mxu0 }
 0x180   :  { %v725_v18 = vadd.f32 %v1481_v61, %v622_v11 }
 0x181   :  { %v714_v13 = vpop.f32.mrf.mxu0 }
 0x182   :  { %v715_v38 = vadd.f32 %v714_v13, %v621_v26  ;;  %v867_v50 = vadd.f32 %v1510_v5, %v725_v18 }
 0x184   :  { %v861_v55 = vadd.f32 %v860_v45, %v715_v38 }
 0x192   :  { %v1568_v12 = vpop.f32.mrf.mxu1 }
 0x194   :  { %v1057_v58 = vpop.f32.mrf.mxu1 }
 0x19b   :  { %v1539_v27 = vpop.f32.mrf.mxu0 }
 0x19c   :  { %v972_v54 = vadd.f32 %v1539_v27, %v867_v50 }
 0x19d   :  { %v964_v32 = vpop.f32.mrf.mxu0 }
 0x19e   :  { %v965_v57 = vadd.f32 %v964_v32, %v861_v55  ;;  %v1066_v62 = vadd.f32 %v1568_v12, %v972_v54 }
 0x1a0   :  { %v1058_v7 = vadd.f32 %v1057_v58, %v965_v57 }
 0x1ae   :  { %v1626_v63 = vpop.f32.mrf.mxu1 }
 0x1b0   :  { %v1265_v8 = vpop.f32.mrf.mxu1 }
 0x1b6   :  { %v1597_v0 = vpop.f32.mrf.mxu0 }
 0x1b7   :  { %v1182_v6 = vadd.f32 %v1597_v0, %v1066_v62 }
 0x1b8   :  { %v1175_v10 = vpop.f32.mrf.mxu0 }
 0x1b9   :  { %v1272_v22 = vadd.f32 %v1626_v63, %v1182_v6  ;;  %v1176_v15 = vadd.f32 %v1175_v10, %v1058_v7 }
 0x1bb   :  { %v1276_v31 = vadd.f32 %v1272_v22, %v575_v14  ;;  %v1266_v21 = vadd.f32 %v1265_v8, %v1176_v15 }
 0x1bd   :  { %1278 = vst [vmem:[#allocation5 + $0x8] sm:$0xff] %v1276_v31  ;;  %v1275_v34 = vadd.f32 %v1266_v21, %v569_v20 }
 0x1bf   :  { %1277 = vst [vmem:[#allocation5] sm:$0xff] %v1275_v34 }
 0x1c0   :  { %1666 = shalt.err (!%p1663_p9)
}
 0x1c1   :  { %1290 = dma.vmem_to_hbm [thread:$0]  %s1285_s19, 256, %s2103_s6, [#allocation4], %s1680_s24, %s1680_s24, %s1681_s25  }
 0x1c2   :  { %1677 = dma.done.wait [#allocation4], 256  }
 0x1c3   :  { %1678 = vsyncadd [#allocation4], 4294967040 }
 0x1c4   :  { %1294 = vsyncpa [#allocation3], 1 }
 0x1c5   :  { %1295 = vsyncpa [#allocation4], 1 }

</bundles_post_ra>
